<compile_context>
chip_gen: v5e
topology: v5e:2x2
jax: 0.10.0
libtpu: 0.0.40
codegen_flags: <defaults>
</compile_context>

<pallas_src>
import functools

import jax
import jax.numpy as jnp
from jax.experimental import pallas as pl
from jax.experimental.pallas import tpu as pltpu


def _round_up(x, m):
    return ((x + m - 1) // m) * m


def _scatter_gates(src, hidden, h_pad):
    """(rows, 4*hidden) -> (rows, 4*h_pad); PyTorch gate g ([i,f,g,o]) lands in
    its own 128-lane-aligned h_pad-wide block.  Padding columns are zero."""
    rows = src.shape[0]
    out = jnp.zeros((rows, 4 * h_pad), src.dtype)
    for g in range(4):
        out = out.at[:, g * h_pad:g * h_pad + hidden].set(
            src[:, g * hidden:(g + 1) * hidden])
    return out


def _pad_rows(src, rows_pad):
    out = jnp.zeros((rows_pad,) + src.shape[1:], src.dtype)
    return out.at[:src.shape[0]].set(src)


def _stacked_lstm_kernel(x0_ref, h0_ref, c0_ref, w_in_ref, w_xh_ref, w_hh_ref,
                         b_ref, h1_ref, c1_ref, hcarry_ref, gacc_ref):
    """Grid = (num_layers, NT). One step = one N-tile of one layer's gates.

    x0_ref:   (b_pad, in_pad)  bf16   external input_feed (resident)
    h0_ref:   (b_pad, h_pad)   f32    layer l previous hidden state
    c0_ref:   (b_pad, h_pad)   f32    layer l previous cell state
    w_in_ref: (in_pad, tn)     bf16   layer-0 input-weight N-tile
    w_xh_ref: (h_pad, tn)      bf16   layer l>=1 input-weight N-tile (slot 0 unused)
    w_hh_ref: (h_pad, tn)      bf16   layer l recurrent-weight N-tile
    b_ref:    (1, tn)          f32    bias N-tile (b_ih + b_hh)
    h1_ref, c1_ref: (b_pad, h_pad)    outputs for layer l (written at last tile)
    hcarry_ref: (b_pad, h_pad) bf16   previous layer's h (inter-layer feed)
    gacc_ref: (NT, b_pad, tn)  f32    per-tile gate pre-activation accumulator
    """
    l = pl.program_id(0)
    n = pl.program_id(1)
    nt = pl.num_programs(1)
    h_pad = h0_ref.shape[-1]
    tn = w_hh_ref.shape[-1]

    # Recurrent contribution + bias for this N-tile (bf16 operands, f32 acc).
    h_prev = h0_ref[...].astype(jnp.bfloat16)
    acc = jnp.dot(h_prev, w_hh_ref[...], preferred_element_type=jnp.float32)
    acc = acc + b_ref[...].astype(jnp.float32)

    # Input contribution: layer 0 consumes the external input_feed; later
    # layers consume the previous layer's h carried in VMEM (never hits HBM).
    @pl.when(l == 0)
    def _():
        gacc_ref[n] = acc + jnp.dot(x0_ref[...], w_in_ref[...],
                                    preferred_element_type=jnp.float32)

    @pl.when(l > 0)
    def _():
        gacc_ref[n] = acc + jnp.dot(hcarry_ref[...], w_xh_ref[...],
                                    preferred_element_type=jnp.float32)

    # On the last N-tile all four gate pre-activations are present: apply the
    # nonlinearities and the LSTM state update.  Gate blocks are static,
    # 128-lane-aligned slices (each tile holds a whole number of gates).
    @pl.when(n == nt - 1)
    def _():
        gates_per_tile = tn // h_pad
        gate = []
        for t in range(gacc_ref.shape[0]):          # static unroll over tiles
            tile = gacc_ref[t]
            for j in range(gates_per_tile):
                gate.append(tile[:, j * h_pad:(j + 1) * h_pad])
        i_g = jax.nn.sigmoid(gate[0])
        f_g = jax.nn.sigmoid(gate[1])
        g_g = jnp.tanh(gate[2])
        o_g = jax.nn.sigmoid(gate[3])
        c1 = f_g * c0_ref[...].astype(jnp.float32) + i_g * g_g
        h1 = o_g * jnp.tanh(c1)
        h1_ref[...] = h1.astype(h1_ref.dtype)
        c1_ref[...] = c1.astype(c1_ref.dtype)
        # TODO(synk): training-mode dropout would be applied here before the
        # carry (eval mode: identity).
        hcarry_ref[...] = h1.astype(hcarry_ref.dtype)


@functools.partial(jax.jit, static_argnames=("rnn_size",))
def _stacked_lstm_forward(input_feed, h_0, c_0, w_in, w_xh, w_hh, b_all, *,
                          rnn_size):
    B, In = input_feed.shape
    L = h_0.shape[0]
    H = rnn_size
    in_pad = w_in.shape[0]
    h_pad = w_in.shape[1] // 4
    n_all = 4 * h_pad
    b_pad = _round_up(max(B, 1), 16)          # 16: bf16 [16,128] vreg packing
    wbytes = w_in.dtype.itemsize
    dtype = jnp.float32                       # state / output dtype

    # ---- generation-aware VMEM budget (leave headroom for Mosaic internals) --
    try:
        vmem_cap = int(pltpu.get_tpu_info().vmem_capacity_bytes)
    except Exception:
        vmem_cap = 0
    if vmem_cap <= 0:
        vmem_cap = 64 * 1024 * 1024           # conservative: v7x per-TensorCore
    vmem_budget = int(0.80 * vmem_cap)        # ~52 MiB v7x, ~105 MiB v5e/v6e

    def _vmem_estimate(nt):
        tn_ = n_all // nt
        stream = 2 * ((in_pad + 2 * h_pad) * tn_ * wbytes + tn_ * 4)   # weights+bias, 2x buffered
        resident = 2 * (b_pad * in_pad * 2 + 4 * b_pad * h_pad * 4)    # x0 + h0/c0/h1/c1
        scratch = b_pad * h_pad * 2 + b_pad * n_all * 4                # hcarry + gacc
        return stream + resident + scratch

    # Smallest N-tile count (must divide the 4 gate blocks) that fits budget.
    NT = 4
    for cand in (1, 2, 4):
        if _vmem_estimate(cand) <= vmem_budget:
            NT = cand
            break
    tn = n_all // NT

    vmem_limit = int(max(16 * 1024 * 1024,
                         min(vmem_budget,
                             _vmem_estimate(NT) + 4 * 1024 * 1024)))

    # ---- pad activations / state to aligned shapes ---------------------------
    # TODO(synk): when driven from a decode loop, keep h/c in the padded
    # (L, b_pad, h_pad) layout between steps and pad x once outside the loop.
    x0 = jnp.zeros((b_pad, in_pad), jnp.bfloat16)
    x0 = x0.at[:B, :In].set(input_feed.astype(jnp.bfloat16))
    h0 = jnp.zeros((L, b_pad, h_pad), dtype).at[:, :B, :H].set(h_0)
    c0 = jnp.zeros((L, b_pad, h_pad), dtype).at[:, :B, :H].set(c_0)

    # Layer-0 input panel: for l > 0 the block index is clamped to the last
    # tile already fetched, so the (possibly large) panel is never re-fetched.
    def w_in_map(l, n):
        return (0, jnp.minimum(n + l * NT, NT - 1))

    grid_spec = pltpu.PrefetchScalarGridSpec(
        num_scalar_prefetch=0,
        grid=(L, NT),
        in_specs=[
            pl.BlockSpec((b_pad, in_pad), lambda l, n: (0, 0)),            # x0
            pl.BlockSpec((None, b_pad, h_pad), lambda l, n: (l, 0, 0)),    # h_0[l]
            pl.BlockSpec((None, b_pad, h_pad), lambda l, n: (l, 0, 0)),    # c_0[l]
            pl.BlockSpec((in_pad, tn), w_in_map),                          # W_in (layer 0)
            pl.BlockSpec((None, h_pad, tn), lambda l, n: (l, 0, n)),       # W_x[l] (l>=1)
            pl.BlockSpec((None, h_pad, tn), lambda l, n: (l, 0, n)),       # W_hh[l]
            pl.BlockSpec((None, 1, tn), lambda l, n: (l, 0, n)),           # bias[l]
        ],
        out_specs=(
            pl.BlockSpec((None, b_pad, h_pad), lambda l, n: (l, 0, 0)),    # h_1[l]
            pl.BlockSpec((None, b_pad, h_pad), lambda l, n: (l, 0, 0)),    # c_1[l]
        ),
        scratch_shapes=[
            pltpu.VMEM((b_pad, h_pad), jnp.bfloat16),   # inter-layer feed
            pltpu.VMEM((NT, b_pad, tn), jnp.float32),   # gate pre-activations
        ],
    )

    flops = 2 * b_pad * n_all * (in_pad + (2 * L - 1) * h_pad)
    transcendentals = 5 * L * b_pad * h_pad
    bytes_accessed = int(
        (in_pad + (2 * L - 1) * h_pad) * n_all * wbytes      # weights
        + L * n_all * 4                                      # biases
        + b_pad * in_pad * 2                                 # x0
        + 4 * L * b_pad * h_pad * 4)                         # h0, c0, h1, c1

    h1p, c1p = pl.pallas_call(
        _stacked_lstm_kernel,
        out_shape=(jax.ShapeDtypeStruct((L, b_pad, h_pad), dtype),
                   jax.ShapeDtypeStruct((L, b_pad, h_pad), dtype)),
        grid_spec=grid_spec,
        compiler_params=pltpu.CompilerParams(
            dimension_semantics=("arbitrary", "arbitrary"),
            vmem_limit_bytes=vmem_limit),
        cost_estimate=pl.CostEstimate(flops=flops,
                                      transcendentals=transcendentals,
                                      bytes_accessed=bytes_accessed),
    )(x0, h0, c0, w_in, w_xh, w_hh, b_all)

    h_1 = h1p[:, :B, :H]
    c_1 = c1p[:, :B, :H]
    return h_1[-1], h_1, c_1


class StackedLSTMPallas:
    """JAX/Pallas equivalent of the PyTorch StackedLSTM module (inference)."""

    def __init__(self, num_layers, input_size, rnn_size, dropout, key,
                 param_dtype=jnp.bfloat16):
        self.num_layers = num_layers
        self.input_size = input_size
        self.rnn_size = rnn_size
        self.dropout = dropout          # inference: nn.Dropout is identity

        H = rnn_size
        self.h_pad = _round_up(max(H, 1), 128)
        self.in_pad = _round_up(max(input_size, 1), 128)

        bound = 1.0 / float(rnn_size) ** 0.5
        self.raw_params = []            # PyTorch-layout params (for the reference)
        w_xh_list, w_hh_list, b_list = [], [], []
        w_in = None
        in_sz = input_size
        for layer in range(num_layers):
            key, k1, k2, k3, k4 = jax.random.split(key, 5)
            w_ih = jax.random.uniform(k1, (4 * H, in_sz), minval=-bound,
                                      maxval=bound, dtype=jnp.float32)
            w_hh = jax.random.uniform(k2, (4 * H, H), minval=-bound,
                                      maxval=bound, dtype=jnp.float32)
            b_ih = jax.random.uniform(k3, (4 * H,), minval=-bound,
                                      maxval=bound, dtype=jnp.float32)
            b_hh = jax.random.uniform(k4, (4 * H,), minval=-bound,
                                      maxval=bound, dtype=jnp.float32)
            self.raw_params.append(
                dict(w_ih=w_ih, w_hh=w_hh, b_ih=b_ih, b_hh=b_hh))

            ih_panel = _pad_rows(_scatter_gates(w_ih.T, H, self.h_pad),
                                 self.in_pad if layer == 0 else self.h_pad)
            hh_panel = _pad_rows(_scatter_gates(w_hh.T, H, self.h_pad),
                                 self.h_pad)
            if layer == 0:
                w_in = ih_panel.astype(param_dtype)            # (in_pad, 4*h_pad)
                # slot 0 of the K=h_pad input-weight stack is unused
                w_xh_list.append(
                    jnp.zeros((self.h_pad, 4 * self.h_pad), param_dtype))
            else:
                w_xh_list.append(ih_panel.astype(param_dtype))
            w_hh_list.append(hh_panel.astype(param_dtype))
            b_list.append(_scatter_gates((b_ih + b_hh)[None, :], H, self.h_pad))
            in_sz = H

        self.w_in = w_in                       # (in_pad, 4*h_pad)      bf16
        self.w_xh = jnp.stack(w_xh_list)       # (L, h_pad, 4*h_pad)    bf16
        self.w_hh = jnp.stack(w_hh_list)       # (L, h_pad, 4*h_pad)    bf16
        self.b_all = jnp.stack(b_list)         # (L, 1, 4*h_pad)        f32

    def __call__(self, input_feed, hidden):
        h_0, c_0 = hidden                       # each (num_layers, B, H)
        out_feed, h_1, c_1 = _stacked_lstm_forward(
            input_feed, h_0, c_0, self.w_in, self.w_xh, self.w_hh, self.b_all,
            rnn_size=self.rnn_size)
        # dropout between layers: identity in eval mode
        return out_feed, (h_1, c_1)


def _reference_forward(model, input_feed, hidden):
    """Pure-jnp f32 reference built from the raw (PyTorch-layout) params."""
    h_0, c_0 = hidden
    H = model.rnn_size
    x = input_feed
    h_1, c_1 = [], []
    for i in range(model.num_layers):
        p = model.raw_params[i]
        gates = x @ p["w_ih"].T + h_0[i] @ p["w_hh"].T + p["b_ih"] + p["b_hh"]
        i_g = jax.nn.sigmoid(gates[:, 0 * H:1 * H])
        f_g = jax.nn.sigmoid(gates[:, 1 * H:2 * H])
        g_g = jnp.tanh(gates[:, 2 * H:3 * H])
        o_g = jax.nn.sigmoid(gates[:, 3 * H:4 * H])
        c1 = f_g * c_0[i] + i_g * g_g
        h1 = o_g * jnp.tanh(c1)
        x = h1
        h_1.append(h1)
        c_1.append(c1)
    return x, (jnp.stack(h_1), jnp.stack(c_1))


if __name__ == "__main__":
    num_layers = 2
    input_size = 64
    rnn_size = 32
    batch = 4

    key = jax.random.PRNGKey(0)
    k_model, k_x, k_h, k_c = jax.random.split(key, 4)

    model = StackedLSTMPallas(num_layers, input_size, rnn_size,
                              dropout=0.0, key=k_model)

    input_feed = jax.random.normal(k_x, (batch, input_size), dtype=jnp.float32)
    h_0 = jax.random.normal(k_h, (num_layers, batch, rnn_size),
                            dtype=jnp.float32)
    c_0 = jax.random.normal(k_c, (num_layers, batch, rnn_size),
                            dtype=jnp.float32)

    out_feed, (h_1, c_1) = model(input_feed, (h_0, c_0))
    jax.block_until_ready((out_feed, h_1, c_1))

    # sanity check against pure-jnp f32 reference (bf16 weights => loose tol)
    ref_feed, (ref_h, ref_c) = _reference_forward(model, input_feed, (h_0, c_0))
    assert out_feed.shape == (batch, rnn_size)
    assert h_1.shape == (num_layers, batch, rnn_size)
    assert c_1.shape == (num_layers, batch, rnn_size)
    assert jnp.allclose(out_feed, ref_feed, atol=3e-2, rtol=3e-2), (
        float(jnp.max(jnp.abs(out_feed - ref_feed))))
    assert jnp.allclose(h_1, ref_h, atol=3e-2, rtol=3e-2)
    assert jnp.allclose(c_1, ref_c, atol=3e-2, rtol=3e-2)

    print("KERNEL_OK")
</pallas_src>

<mosaic_0001>
module attributes {stable_mosaic.version = 11 : i64} {
  func.func @_stacked_lstm_kernel(%arg0: i32, %arg1: i32, %arg2: memref<16x128xbf16, #tpu.memory_space<vmem>>, %arg3: memref<1x16x128xf32, #tpu.memory_space<vmem>>, %arg4: memref<1x16x128xf32, #tpu.memory_space<vmem>>, %arg5: memref<128x512xbf16, #tpu.memory_space<vmem>>, %arg6: memref<1x128x512xbf16, #tpu.memory_space<vmem>>, %arg7: memref<1x128x512xbf16, #tpu.memory_space<vmem>>, %arg8: memref<1x1x512xf32, #tpu.memory_space<vmem>>, %arg9: memref<1x16x128xf32, #tpu.memory_space<vmem>>, %arg10: memref<1x16x128xf32, #tpu.memory_space<vmem>>, %arg11: memref<16x128xbf16, #tpu.memory_space<vmem>>, %arg12: memref<1x16x512xf32, #tpu.memory_space<vmem>>) attributes {dimension_semantics = [#tpu.dimension_semantics<arbitrary>, #tpu.dimension_semantics<arbitrary>], iteration_bounds = array<i64: 2, 1>, scalar_prefetch = 0 : i64, scratch_operands = 2 : i64, tpu.core_type = #tpu.core_type<tc>, window_params = [{pipeline_mode = #tpu.pipeline_mode<synchronous>, transform_indices = @transform_0, window_bounds = array<i64: 16, 128>}, {transform_indices = @transform_1, window_bounds = array<i64: 1, 16, 128>}, {transform_indices = @transform_2, window_bounds = array<i64: 1, 16, 128>}, {transform_indices = @transform_3, window_bounds = array<i64: 128, 512>}, {transform_indices = @transform_4, window_bounds = array<i64: 1, 128, 512>}, {transform_indices = @transform_5, window_bounds = array<i64: 1, 128, 512>}, {transform_indices = @transform_6, window_bounds = array<i64: 1, 1, 512>}, {transform_indices = @transform_7, window_bounds = array<i64: 1, 16, 128>}, {transform_indices = @transform_8, window_bounds = array<i64: 1, 16, 128>}]} {
    %c0 = arith.constant 0 : index
    %c0_0 = arith.constant 0 : index
    %c0_1 = arith.constant 0 : index
    %0 = vector.load %arg3[%c0, %c0_0, %c0_1] : memref<1x16x128xf32, #tpu.memory_space<vmem>>, vector<1x16x128xf32>
    %1 = vector.shape_cast %0 : vector<1x16x128xf32> to vector<16x128xf32>
    %2 = arith.truncf %1 : vector<16x128xf32> to vector<16x128xbf16>
    %c0_2 = arith.constant 0 : index
    %c0_3 = arith.constant 0 : index
    %c0_4 = arith.constant 0 : index
    %3 = vector.load %arg7[%c0_2, %c0_3, %c0_4] : memref<1x128x512xbf16, #tpu.memory_space<vmem>>, vector<1x128x512xbf16>
    %4 = vector.shape_cast %3 : vector<1x128x512xbf16> to vector<128x512xbf16>
    %cst = arith.constant dense<0.000000e+00> : vector<16x512xf32>
    %5 = tpu.matmul %2, %4, %cst {dimension_numbers = #tpu.dot_dimension_numbers<[1], [0], [0], [1], [0, 0, 1, 1], [], []>} : vector<16x128xbf16>, vector<128x512xbf16>, vector<16x512xf32> -> vector<16x512xf32>
    %c0_5 = arith.constant 0 : index
    %c0_6 = arith.constant 0 : index
    %c0_7 = arith.constant 0 : index
    %6 = vector.load %arg8[%c0_5, %c0_6, %c0_7] : memref<1x1x512xf32, #tpu.memory_space<vmem>>, vector<1x1x512xf32>
    %7 = vector.shape_cast %6 : vector<1x1x512xf32> to vector<1x512xf32>
    %8 = vector.broadcast %7 : vector<1x512xf32> to vector<16x512xf32>
    %9 = arith.addf %5, %8 : vector<16x512xf32>
    %c0_i32 = arith.constant 0 : i32
    %10 = arith.cmpi eq, %arg0, %c0_i32 : i32
    %11 = arith.extui %10 : i1 to i32
    %c0_i32_8 = arith.constant 0 : i32
    %12 = arith.cmpi ne, %11, %c0_i32_8 : i32
    scf.if %12 {
      %c0_13 = arith.constant 0 : index
      %c0_14 = arith.constant 0 : index
      %19 = vector.load %arg2[%c0_13, %c0_14] : memref<16x128xbf16, #tpu.memory_space<vmem>>, vector<16x128xbf16>
      %c0_15 = arith.constant 0 : index
      %c0_16 = arith.constant 0 : index
      %20 = vector.load %arg5[%c0_15, %c0_16] : memref<128x512xbf16, #tpu.memory_space<vmem>>, vector<128x512xbf16>
      %cst_17 = arith.constant dense<0.000000e+00> : vector<16x512xf32>
      %21 = tpu.matmul %19, %20, %cst_17 {dimension_numbers = #tpu.dot_dimension_numbers<[1], [0], [0], [1], [0, 0, 1, 1], [], []>} : vector<16x128xbf16>, vector<128x512xbf16>, vector<16x512xf32> -> vector<16x512xf32>
      %22 = arith.addf %9, %21 : vector<16x512xf32>
      %23 = arith.index_cast %arg1 : i32 to index
      %c0_18 = arith.constant 0 : index
      %c0_19 = arith.constant 0 : index
      %24 = vector.load %arg12[%23, %c0_18, %c0_19] : memref<1x16x512xf32, #tpu.memory_space<vmem>>, vector<1x16x512xf32>
      %25 = vector.shape_cast %24 : vector<1x16x512xf32> to vector<16x512xf32>
      %26 = vector.shape_cast %22 : vector<16x512xf32> to vector<1x16x512xf32>
      tpu.vector_store %arg12[%23, %c0_18, %c0_19], %26 {strides = array<i32>} : memref<1x16x512xf32, #tpu.memory_space<vmem>>, vector<1x16x512xf32>,
    } else {
    }
    %c0_i32_9 = arith.constant 0 : i32
    %13 = arith.cmpi sgt, %arg0, %c0_i32_9 : i32
    %14 = arith.extui %13 : i1 to i32
    %c0_i32_10 = arith.constant 0 : i32
    %15 = arith.cmpi ne, %14, %c0_i32_10 : i32
    scf.if %15 {
      %c0_13 = arith.constant 0 : index
      %c0_14 = arith.constant 0 : index
      %19 = vector.load %arg11[%c0_13, %c0_14] : memref<16x128xbf16, #tpu.memory_space<vmem>>, vector<16x128xbf16>
      %c0_15 = arith.constant 0 : index
      %c0_16 = arith.constant 0 : index
      %c0_17 = arith.constant 0 : index
      %20 = vector.load %arg6[%c0_15, %c0_16, %c0_17] : memref<1x128x512xbf16, #tpu.memory_space<vmem>>, vector<1x128x512xbf16>
      %21 = vector.shape_cast %20 : vector<1x128x512xbf16> to vector<128x512xbf16>
      %cst_18 = arith.constant dense<0.000000e+00> : vector<16x512xf32>
      %22 = tpu.matmul %19, %21, %cst_18 {dimension_numbers = #tpu.dot_dimension_numbers<[1], [0], [0], [1], [0, 0, 1, 1], [], []>} : vector<16x128xbf16>, vector<128x512xbf16>, vector<16x512xf32> -> vector<16x512xf32>
      %23 = arith.addf %9, %22 : vector<16x512xf32>
      %24 = arith.index_cast %arg1 : i32 to index
      %c0_19 = arith.constant 0 : index
      %c0_20 = arith.constant 0 : index
      %25 = vector.load %arg12[%24, %c0_19, %c0_20] : memref<1x16x512xf32, #tpu.memory_space<vmem>>, vector<1x16x512xf32>
      %26 = vector.shape_cast %25 : vector<1x16x512xf32> to vector<16x512xf32>
      %27 = vector.shape_cast %23 : vector<16x512xf32> to vector<1x16x512xf32>
      tpu.vector_store %arg12[%24, %c0_19, %c0_20], %27 {strides = array<i32>} : memref<1x16x512xf32, #tpu.memory_space<vmem>>, vector<1x16x512xf32>,
    } else {
    }
    %c0_i32_11 = arith.constant 0 : i32
    %16 = arith.cmpi eq, %arg1, %c0_i32_11 : i32
    %17 = arith.extui %16 : i1 to i32
    %c0_i32_12 = arith.constant 0 : i32
    %18 = arith.cmpi ne, %17, %c0_i32_12 : i32
    scf.if %18 {
      %c0_13 = arith.constant 0 : index
      %c0_14 = arith.constant 0 : index
      %c0_15 = arith.constant 0 : index
      %19 = vector.load %arg12[%c0_13, %c0_14, %c0_15] : memref<1x16x512xf32, #tpu.memory_space<vmem>>, vector<1x16x512xf32>
      %20 = vector.shape_cast %19 : vector<1x16x512xf32> to vector<16x512xf32>
      %21 = vector.extract_strided_slice %20 {offsets = [0, 0], sizes = [16, 128], strides = [1, 1]} : vector<16x512xf32> to vector<16x128xf32>
      %22 = vector.extract_strided_slice %20 {offsets = [0, 128], sizes = [16, 128], strides = [1, 1]} : vector<16x512xf32> to vector<16x128xf32>
      %23 = vector.extract_strided_slice %20 {offsets = [0, 256], sizes = [16, 128], strides = [1, 1]} : vector<16x512xf32> to vector<16x128xf32>
      %24 = vector.extract_strided_slice %20 {offsets = [0, 384], sizes = [16, 128], strides = [1, 1]} : vector<16x512xf32> to vector<16x128xf32>
      %25 = arith.negf %21 : vector<16x128xf32>
      %26 = math.exp %25 : vector<16x128xf32>
      %cst_16 = arith.constant 1.000000e+00 : f32
      %27 = vector.broadcast %cst_16 : f32 to vector<16x128xf32>
      %28 = arith.addf %27, %26 : vector<16x128xf32>
      %29 = arith.divf %27, %28 : vector<16x128xf32>
      %30 = arith.negf %22 : vector<16x128xf32>
      %31 = math.exp %30 : vector<16x128xf32>
      %cst_17 = arith.constant 1.000000e+00 : f32
      %32 = vector.broadcast %cst_17 : f32 to vector<16x128xf32>
      %33 = arith.addf %32, %31 : vector<16x128xf32>
      %34 = arith.divf %32, %33 : vector<16x128xf32>
      %35 = math.tanh %23 : vector<16x128xf32>
      %36 = arith.negf %24 : vector<16x128xf32>
      %37 = math.exp %36 : vector<16x128xf32>
      %cst_18 = arith.constant 1.000000e+00 : f32
      %38 = vector.broadcast %cst_18 : f32 to vector<16x128xf32>
      %39 = arith.addf %38, %37 : vector<16x128xf32>
      %40 = arith.divf %38, %39 : vector<16x128xf32>
      %c0_19 = arith.constant 0 : index
      %c0_20 = arith.constant 0 : index
      %c0_21 = arith.constant 0 : index
      %41 = vector.load %arg4[%c0_19, %c0_20, %c0_21] : memref<1x16x128xf32, #tpu.memory_space<vmem>>, vector<1x16x128xf32>
      %42 = vector.shape_cast %41 : vector<1x16x128xf32> to vector<16x128xf32>
      %43 = arith.mulf %34, %42 : vector<16x128xf32>
      %44 = arith.mulf %29, %35 : vector<16x128xf32>
      %45 = arith.addf %43, %44 : vector<16x128xf32>
      %46 = math.tanh %45 : vector<16x128xf32>
      %47 = arith.mulf %40, %46 : vector<16x128xf32>
      %c0_22 = arith.constant 0 : index
      %c0_23 = arith.constant 0 : index
      %c0_24 = arith.constant 0 : index
      %48 = vector.load %arg9[%c0_22, %c0_23, %c0_24] : memref<1x16x128xf32, #tpu.memory_space<vmem>>, vector<1x16x128xf32>
      %49 = vector.shape_cast %48 : vector<1x16x128xf32> to vector<16x128xf32>
      %50 = vector.shape_cast %47 : vector<16x128xf32> to vector<1x16x128xf32>
      tpu.vector_store %arg9[%c0_22, %c0_23, %c0_24], %50 {strides = array<i32>} : memref<1x16x128xf32, #tpu.memory_space<vmem>>, vector<1x16x128xf32>,
      %c0_25 = arith.constant 0 : index
      %c0_26 = arith.constant 0 : index
      %c0_27 = arith.constant 0 : index
      %51 = vector.load %arg10[%c0_25, %c0_26, %c0_27] : memref<1x16x128xf32, #tpu.memory_space<vmem>>, vector<1x16x128xf32>
      %52 = vector.shape_cast %51 : vector<1x16x128xf32> to vector<16x128xf32>
      %53 = vector.shape_cast %45 : vector<16x128xf32> to vector<1x16x128xf32>
      tpu.vector_store %arg10[%c0_25, %c0_26, %c0_27], %53 {strides = array<i32>} : memref<1x16x128xf32, #tpu.memory_space<vmem>>, vector<1x16x128xf32>,
      %54 = arith.truncf %47 : vector<16x128xf32> to vector<16x128xbf16>
      %c0_28 = arith.constant 0 : index
      %c0_29 = arith.constant 0 : index
      %55 = vector.load %arg11[%c0_28, %c0_29] : memref<16x128xbf16, #tpu.memory_space<vmem>>, vector<16x128xbf16>
      tpu.vector_store %arg11[%c0_28, %c0_29], %54 {strides = array<i32>} : memref<16x128xbf16, #tpu.memory_space<vmem>>, vector<16x128xbf16>,
    } else {
    }
    return
  }
  func.func @transform_0(%arg0: i32, %arg1: i32) -> (i32, i32) {
    %c0_i32 = arith.constant 0 : i32
    %c0_i32_0 = arith.constant 0 : i32
    %c0_i32_1 = arith.constant 0 : i32
    return %c0_i32, %c0_i32_0 : i32, i32
  }
  func.func @transform_1(%arg0: i32, %arg1: i32) -> (i32, i32, i32) {
    %c0_i32 = arith.constant 0 : i32
    %c0_i32_0 = arith.constant 0 : i32
    %c0_i32_1 = arith.constant 0 : i32
    return %arg0, %c0_i32, %c0_i32_0 : i32, i32, i32
  }
  func.func @transform_2(%arg0: i32, %arg1: i32) -> (i32, i32, i32) {
    %c0_i32 = arith.constant 0 : i32
    %c0_i32_0 = arith.constant 0 : i32
    %c0_i32_1 = arith.constant 0 : i32
    return %arg0, %c0_i32, %c0_i32_0 : i32, i32, i32
  }
  func.func @transform_3(%arg0: i32, %arg1: i32) -> (i32, i32) {
    %c1_i32 = arith.constant 1 : i32
    %0 = arith.muli %arg0, %c1_i32 : i32
    %1 = arith.addi %arg1, %0 : i32
    %c0_i32 = arith.constant 0 : i32
    %2 = arith.minsi %1, %c0_i32 : i32
    %c0_i32_0 = arith.constant 0 : i32
    %c0_i32_1 = arith.constant 0 : i32
    return %c0_i32_0, %2 : i32, i32
  }
  func.func @transform_4(%arg0: i32, %arg1: i32) -> (i32, i32, i32) {
    %c0_i32 = arith.constant 0 : i32
    %c0_i32_0 = arith.constant 0 : i32
    return %arg0, %c0_i32, %arg1 : i32, i32, i32
  }
  func.func @transform_5(%arg0: i32, %arg1: i32) -> (i32, i32, i32) {
    %c0_i32 = arith.constant 0 : i32
    %c0_i32_0 = arith.constant 0 : i32
    return %arg0, %c0_i32, %arg1 : i32, i32, i32
  }
  func.func @transform_6(%arg0: i32, %arg1: i32) -> (i32, i32, i32) {
    %c0_i32 = arith.constant 0 : i32
    %c0_i32_0 = arith.constant 0 : i32
    return %arg0, %c0_i32, %arg1 : i32, i32, i32
  }
  func.func @transform_7(%arg0: i32, %arg1: i32) -> (i32, i32, i32) {
    %c0_i32 = arith.constant 0 : i32
    %c0_i32_0 = arith.constant 0 : i32
    %c0_i32_1 = arith.constant 0 : i32
    return %arg0, %c0_i32, %c0_i32_0 : i32, i32, i32
  }
  func.func @transform_8(%arg0: i32, %arg1: i32) -> (i32, i32, i32) {
    %c0_i32 = arith.constant 0 : i32
    %c0_i32_0 = arith.constant 0 : i32
    %c0_i32_1 = arith.constant 0 : i32
    return %arg0, %c0_i32, %c0_i32_0 : i32, i32, i32
  }
}

</mosaic_0001>

<bundles_post_ra>
// kernel: _stacked_lstm_forward.1
= control target key start
LH: loop header
LB: loop body
LE: loop exit
PB: predicated region body
PF: predicated region fallthrough
CT: control target
= control target key end

     0   :  { %s3106_s0 = inlined_call_operand.vmem [shape: bf16[16,128], index: 0, kind: input, shape index: {}]   ;;  %s3107_s1 = inlined_call_operand.vmem [shape: f32[2,16,128], index: 1, kind: input, shape index: {}]   ;;  %s3108_s2 = inlined_call_operand.vmem [shape: f32[2,16,128], index: 2, kind: input, shape index: {}]   ;;  %s3109_s3 = inlined_call_operand.hbm [shape: bf16[128,512], index: 3, kind: input, shape index: {}]   ;;  %s3110_s4 = inlined_call_operand.hbm [shape: bf16[2,128,512], index: 4, kind: input, shape index: {}]   ;;  %s3111_s5 = inlined_call_operand.hbm [shape: bf16[2,128,512], index: 5, kind: input, shape index: {}]   ;;  %s3112_s6 = inlined_call_operand.vmem [shape: f32[2,1,512], index: 6, kind: input, shape index: {}]   ;;  %s3113_s7 = inlined_call_operand.vmem [shape: f32[2,16,128], index: 7, kind: output, shape index: {0}]   ;;  %s3114_s8 = inlined_call_operand.vmem [shape: f32[2,16,128], index: 8, kind: output, shape index: {1}]  }
   0x1   :  { %3118 = sst [smem:[#allocation14_spill]] %s3110_s4 }
   0x2   :  { %14 = vsyncpa [#allocation5], 0 }
   0x3   :  { %16 = vsyncpa [#allocation5 + $0x1], 0 }
   0x4   :  { %17 = vsyncpa [#allocation7], 0 }
   0x5   :  { %19 = vsyncpa [#allocation7 + $0x1], 0  ;;  %s2573_s27 = smov 0   ;;  %s2575_s28 = smov 0  }
   0x6   :  { %s2577_s29 = smov 0   ;;  %s2579_s30 = smov 0  }
   0x7   :  { %s2581_s9 = smov 0   ;;  %s2583_s10 = smov 0  }
   0x8   :  { %s2585_s11 = smov 0   ;;  %s2587_s12 = smov 0  }
   0x9 LB: > { %3119 = sst [smem:[#allocation11_spill]] %s2519_s11  ;;  %s3115_s13 = sadd.s32 4294967295, %s2523_s12   ;;  %s2523_s12 = sphi %s2587_s12, %s25_s12   ;;  %s2519_s11 = sphi %s2585_s11, %s3148_s11   ;;  %s2515_s10 = sphi %s2583_s10, %s3153_s10   ;;  %s2511_s9 = sphi %s2581_s9, %s3096_s9   ;;  %s2507_s30 = sphi %s2579_s30, %s3152_s30   ;;  %s2503_s29 = sphi %s2577_s29, %s3151_s29   ;;  %s2499_s28 = sphi %s2575_s28, %s3150_s28   ;;  %s2495_s27 = sphi %s2573_s27, %s3149_s27  }
   0xa   : > { %s37_s14 = sadd.s32 1, %s2519_s11  ;;  %p131_p1 = scmp.eq.s32.totalorder %s2523_s12, 0 }
   0xb   : > { %p39_p0 = scmp.ge.s32.totalorder %s37_s14, 2  ;;  %p2616_p2 = scmp.eq.s32.totalorder %s3115_s13, 0 }
   0xc   : > { %s151_s16 = sadd.s32 1, %s2503_s29  ;;  %p158_p3 = scmp.ne.s32.totalorder %s2503_s29, %s2499_s28 }
   0xd   : > { %s3155_s14 = smov (%p39_p0, %s37_s14), 0  ;;  %p164_p4 = scmp.ne.s32.totalorder %s2499_s28, %s2495_s27 }
   0xe   : > { %3121 = sst [smem:[#allocation12_spill]] %s3155_s14  ;;  %s146_s17 = ssub.s32 %s2519_s11, %s3155_s14 }
   0xf   : > { %p149_p5 = scmp.eq.s32.totalorder %s146_s17, 0  ;;  %p2630_p6 = por %p158_p3, %p131_p1 }
  0x10   : > { %p2636_p7 = por %p164_p4, %p2616_p2  ;;  %p2251_p8 = scmp.lt.s32.totalorder %s2523_s12, 2 }
  0x11   : > { %s2642_s20 = scalar_select %p149_p5, %s2503_s29, %s151_s16  }
  0x12   : > { %s340_s21 = sand.u32 1, %s2523_s12   ;;  %s342_s22 = sand.u32 1, %s2503_s29  }
  0x13   : > { %3124 = sst [smem:[#allocation13_spill]] %s2642_s20  ;;  %s1704_s23 = sshll.u32 %s342_s22, 8 }
  0x14   : > { %s2126_s24 = sshll.u32 %s2519_s11, 8  ;;  %s3125_s4 = sld [smem:[#allocation14_spill]] }
  0x15   : > { %s344_s17 = scalar_lea.vmem [#allocation6], %s1704_s23  ;;  %p2654_p9 = pnand %p2251_p8, %p2630_p6 }
  0x16   : > { %s354_s13 = sshll.u32 %s344_s17, 4  ;;  %s375_s25 = scalar_lea.hbm %s3111_s5, %s2126_s24  ;;  %s355_s13 = int_to_ptr.vmem [resolvable:$true] %s354_s13 }
  0x17   : > { %s376_s26 = sshll.u32 %s375_s25, 4  ;;  %s2525_s17 = smov 256   ;;  %s377_s26 = int_to_ptr.hbm [resolvable:$true] %s376_s26 }
  0x18   : > { %s368_s18 = scalar_lea.vmem [#allocation8], %s1704_s23  ;;  %p1710_p10 = scmp.ge.s32.totalorder %s2523_s12, 1 }
  0x19   : > { %s378_s20 = sshll.u32 %s368_s18, 4  ;;  %p398_p11 = scmp.lt.s32.totalorder %s2523_s12, 3  ;;  %s379_s20 = int_to_ptr.vmem [resolvable:$true] %s378_s20 }
  0x1a   : > { %s351_s27 = scalar_lea.hbm %s3125_s4, %s2126_s24  ;;  %s2526_s4 = smov 16  }
  0x1b   : > { %s352_s14 = sshll.u32 %s351_s27, 4  ;;  %s341_s27 = scalar_lea.sflag [#allocation7], %s340_s21  ;;  %s353_s14 = int_to_ptr.hbm [resolvable:$true] %s352_s14 }
  0x1c   : > { %2247 = dma.hbm_to_vmem [thread:$0]  (!%p2654_p9), %s353_s14, 4096, %s355_s13, %s341_s27, %s2525_s17, %s2525_s17, %s2526_s4  }
  0x1d   : > { %p2668_p12 = pnand %p1710_p10, %p398_p11  ;;  %p2492_p13 = scmp.ne.s32.totalorder %s2511_s9, 0 }
  0x1e   : > { %p136_p3 = scmp.ne.s32.totalorder %s2511_s9, %s2507_s30  ;;  %s2527_s13 = smov [#allocation4]  }
  0x1f   : > { %p132_p0 = por %p2492_p13, %p131_p1  ;;  %s330_s14 = sshll.u32 %s2527_s13, 4  ;;  %s331_s14 = int_to_ptr.vmem [resolvable:$true] %s330_s14 }
  0x20   : > { %p2679_p4 = por %p2616_p2, %p136_p3  ;;  %s328_s22 = sshll.u32 %s3109_s3, 4  ;;  %s329_s22 = int_to_ptr.hbm [resolvable:$true] %s328_s22 }
  0x21   : > { %p2242_p5 = pnand %p2251_p8, %p132_p0  ;;  %s2418_s30 = sshra.s32 %s329_s22, 4  ;;  %s2419_s30 = int_to_ptr.hbm [resolvable:$true] %s2418_s30 }
  0x22   : > { %2250 = dma.hbm_to_vmem [thread:$0]  (!%p2654_p9), %s377_s26, 4096, %s379_s20, %s341_s27, %s2525_s17, %s2525_s17, %s2526_s4  }
  0x23   : > { %s2420_s15 = scalar_lea.hbm %s2419_s30, 256  ;;  %p2422_p2 = pneg %p2242_p5 }
  0x24   : > { %p2421_p1 = scmp.ne.s32.totalorder %s2419_s30, %s2420_s15  ;;  %s2425_s13 = scalar_lea.hbm %s3109_s3, 256 }
  0x25   : > { %p2427_p11 = scmp.lt.s32.totalorder %s2425_s13, %s2420_s15 }
  0x26   : > { %p2423_p6 = pnand %p2422_p2, %p2421_p1 }
  0x28   : > { %p2424_p10 = pneg %p2423_p6 }
  0x2a   : > { %p2429_p13 = pnand %p2427_p11, %p2424_p10 }
  0x2c   : > { %2432 = shalt.err (!%p2429_p13)
}
  0x2d   : > { %2244 = dma.hbm_to_vmem [thread:$0]  (!%p2242_p5), %s329_s22, 4096, %s331_s14, [#allocation5], %s2525_s17, %s2525_s17, %s2526_s4  }
  0x2e   : > { %402 = sbr.rel (%p2668_p12) target bundleno = 650 (0x28a), region = 48  ;;  %s404_s20 = sand.u32 (!%p2668_p12), 1, %s2511_s9  }
  0x2f   : > { %s1711_s16 = sshll.u32 (!%p2668_p12), %s404_s20, 8  ;;  %s405_s26 = scalar_lea.sflag (!%p2668_p12), [#allocation5], %s404_s20 }
  0x30   : > { %s2702_s27 = scalar_lea.vmem (!%p2668_p12), [#allocation4], %s1711_s16 }
  0x33   : > { %2485 = dma.done.wait (%p2679_p4), %s405_s26, 4096  }
  0x34   : > { %2487 = vsyncadd (%p2679_p4), %s405_s26, 4294963200  ;;  %s3129_s23 = sadd.s32 4294967295, %s2523_s12   ;;  %s416_s17 = sand.u32 1, %s2499_s28  }
  0x35   : > { %s414_s4 = sand.u32 1, %s3129_s23   ;;  %s1712_s11 = sshll.u32 %s416_s17, 8 }
  0x36   : > { %s415_s14 = scalar_lea.sflag [#allocation7], %s414_s4  ;;  %s2711_s24 = scalar_lea.vmem [#allocation6], %s1712_s11 }
  0x37   : > { %2489 = dma.done.wait (%p2636_p7), %s415_s14, 8192  }
  0x38   : > { %2491 = vsyncadd (%p2636_p7), %s415_s14, 4294959104  ;;  %p495_p8 = scmp.lt.s32.totalorder %s2515_s10, 1  ;;  %s2742_s23 = scalar_lea.vmem [#allocation8], %s1712_s11 }
  0x39   : > { %v1837_v0 = vld [vmem:[%s2742_s23 + $0xe0] sm:$0xf]  ;;  %v2162_v1 = vld [vmem:[%s2742_s23 + $0xec] sm:$0xf0]  ;;  %v2160_v2 = vld [vmem:[%s2742_s23 + $0xe4] sm:$0xf] }
  0x3a   : > { %s2719_s21 = scalar_select %p495_p8, %s2515_s10, 1  ;;  %v1838_v3 = vor.u32 %v2162_v1, %v1837_v0  ;;  %v1839_v4 = vld [vmem:[%s2742_s23 + $0xf0] sm:$0xf0]  ;;  %v1845_v5 = vld [vmem:[%s2742_s23 + $0xe8] sm:$0xf] }
  0x3b   : > { %v2163_v6 = vld [vmem:[%s2742_s23 + $0xf4] sm:$0xf0]  ;;  %v1842_v7 = vor.u32 %v2160_v2, %v1839_v4  ;;  %v2161_v9 = vld [vmem:[%s2742_s23 + $0xec] sm:$0xf]  ;;  %v1847_v10 = vld [vmem:[%s2742_s23 + $0xf8] sm:$0xf0] }
  0x3c   : > { %s2722_s22 = sshll.u32 %s2719_s21, 4  ;;  %v1846_v8 = vor.u32 %v2163_v6, %v1845_v5  ;;  %v1821_v11 = vld [vmem:[%s2742_s23 + $0xc0] sm:$0xf]  ;;  %735 = vmatpush.bf16.msra.mxu0 %v1838_v3  ;;  %v1850_v12 = vor.u32 %v2161_v9, %v1847_v10  ;;  %v2158_v13 = vld [vmem:[%s2742_s23 + $0xcc] sm:$0xf0]  ;;  %s1718_s14 = sshll.u32 %s2719_s21, 2 }
  0x3d   : > { %s2728_s25 = scalar_lea.vmem %s3108_s2, %s2722_s22  ;;  %s2734_s19 = scalar_lea.vmem %s3113_s7, %s2722_s22  ;;  %v2156_v14 = vld [vmem:[%s2742_s23 + $0xc4] sm:$0xf]  ;;  %v1823_v15 = vld [vmem:[%s2742_s23 + $0xd0] sm:$0xf0]  ;;  %749 = vmatpush.bf16.msra.mxu1 %v1842_v7  ;;  %v1822_v16 = vor.u32 %v2158_v13, %v1821_v11  ;;  %v1829_v18 = vld [vmem:[%s2742_s23 + $0xc8] sm:$0xf] }
  0x3e   : > { %s2740_s26 = scalar_lea.vmem %s3114_s8, %s2722_s22  ;;  %763 = vmatpush.bf16.msra.mxu2 %v1846_v8  ;;  %v1826_v17 = vor.u32 %v2156_v14, %v1823_v15  ;;  %v2159_v19 = vld [vmem:[%s2742_s23 + $0xd4] sm:$0xf0]  ;;  %v2157_v20 = vld [vmem:[%s2742_s23 + $0xcc] sm:$0xf]  ;;  %777 = vmatpush.bf16.msra.mxu3 %v1850_v12  ;;  %v1831_v22 = vld [vmem:[%s2742_s23 + $0xd8] sm:$0xf0]  ;;  %s499_s11 = scalar_lea.vmem %s3107_s1, %s2722_s22 }
  0x3f   : > { %v1830_v21 = vor.u32 %v2159_v19, %v1829_v18  ;;  %v1805_v23 = vld [vmem:[%s2742_s23 + $0xa0] sm:$0xf]  ;;  %v2154_v24 = vld [vmem:[%s2742_s23 + $0xac] sm:$0xf0]  ;;  %v1834_v25 = vor.u32 %v2157_v20, %v1831_v22  ;;  %v2152_v26 = vld [vmem:[%s2742_s23 + $0xa4] sm:$0xf]  ;;  %s518_s15 = scalar_lea.vmem %s3112_s6, %s1718_s14 }
  0x40   : > { %v1807_v27 = vld [vmem:[%s2742_s23 + $0xb0] sm:$0xf0]  ;;  %v1813_v28 = vld [vmem:[%s2742_s23 + $0xa8] sm:$0xf]  ;;  %736 = vmatpush.bf16.msra.mxu0 %v1822_v16  ;;  %v1806_v29 = vor.u32 %v2154_v24, %v1805_v23  ;;  %v2155_v30 = vld [vmem:[%s2742_s23 + $0xb4] sm:$0xf0] }
  0x41   : > { %v2153_v31 = vld [vmem:[%s2742_s23 + $0xac] sm:$0xf]  ;;  %v1815_v32 = vld [vmem:[%s2742_s23 + $0xb8] sm:$0xf0]  ;;  %750 = vmatpush.bf16.msra.mxu1 %v1826_v17  ;;  %v1810_v33 = vor.u32 %v2152_v26, %v1807_v27  ;;  %v1814_v34 = vor.u32 %v2155_v30, %v1813_v28  ;;  %v1789_v35 = vld [vmem:[%s2742_s23 + $0x80] sm:$0xf] }
  0x42   : > { %764 = vmatpush.bf16.msra.mxu2 %v1830_v21  ;;  %v2150_v36 = vld [vmem:[%s2742_s23 + $0x8c] sm:$0xf0]  ;;  %v2148_v37 = vld [vmem:[%s2742_s23 + $0x84] sm:$0xf]  ;;  %778 = vmatpush.bf16.msra.mxu3 %v1834_v25  ;;  %v1818_v38 = vor.u32 %v2153_v31, %v1815_v32  ;;  %v1791_v39 = vld [vmem:[%s2742_s23 + $0x90] sm:$0xf0] }
  0x43   : > { %v1797_v40 = vld [vmem:[%s2742_s23 + $0x88] sm:$0xf]  ;;  %v2151_v41 = vld [vmem:[%s2742_s23 + $0x94] sm:$0xf0]  ;;  %v2149_v42 = vld [vmem:[%s2742_s23 + $0x8c] sm:$0xf]  ;;  %v1790_v44 = vor.u32 %v2150_v36, %v1789_v35  ;;  %v1794_v45 = vor.u32 %v2148_v37, %v1791_v39 }
  0x44   : > { %v1799_v43 = vld [vmem:[%s2742_s23 + $0x98] sm:$0xf0]  ;;  %737 = vmatpush.bf16.msra.mxu0 %v1806_v29  ;;  %v1798_v46 = vor.u32 %v2151_v41, %v1797_v40  ;;  %v1773_v47 = vld [vmem:[%s2742_s23 + $0x60] sm:$0xf]  ;;  %v2146_v48 = vld [vmem:[%s2742_s23 + $0x6c] sm:$0xf0] }
  0x45   : > { %751 = vmatpush.bf16.msra.mxu1 %v1810_v33  ;;  %v2144_v49 = vld [vmem:[%s2742_s23 + $0x64] sm:$0xf]  ;;  %v1802_v50 = vor.u32 %v2149_v42, %v1799_v43  ;;  %v1775_v51 = vld [vmem:[%s2742_s23 + $0x70] sm:$0xf0]  ;;  %v1781_v52 = vld [vmem:[%s2742_s23 + $0x68] sm:$0xf]  ;;  %v1774_v56 = vor.u32 %v2146_v48, %v1773_v47 }
  0x46   : > { %765 = vmatpush.bf16.msra.mxu2 %v1814_v34  ;;  %779 = vmatpush.bf16.msra.mxu3 %v1818_v38  ;;  %v2147_v53 = vld [vmem:[%s2742_s23 + $0x74] sm:$0xf0]  ;;  %v2145_v54 = vld [vmem:[%s2742_s23 + $0x6c] sm:$0xf]  ;;  %v1783_v55 = vld [vmem:[%s2742_s23 + $0x78] sm:$0xf0]  ;;  %v1778_v57 = vor.u32 %v2144_v49, %v1775_v51 }
  0x47   : > { %v1782_v58 = vor.u32 %v2147_v53, %v1781_v52  ;;  %v1757_v59 = vld [vmem:[%s2742_s23 + $0x40] sm:$0xf]  ;;  %v2142_v60 = vld [vmem:[%s2742_s23 + $0x4c] sm:$0xf0]  ;;  %v2140_v61 = vld [vmem:[%s2742_s23 + $0x44] sm:$0xf]  ;;  %v1786_v62 = vor.u32 %v2145_v54, %v1783_v55 }
  0x48   : > { %738 = vmatpush.bf16.msra.mxu0 %v1790_v44  ;;  %v1759_v63 = vld [vmem:[%s2742_s23 + $0x50] sm:$0xf0]  ;;  %v1765_v0 = vld [vmem:[%s2742_s23 + $0x48] sm:$0xf]  ;;  %v2143_v1 = vld [vmem:[%s2742_s23 + $0x54] sm:$0xf0]  ;;  %v1758_v4 = vor.u32 %v2142_v60, %v1757_v59 }
  0x49   : > { %752 = vmatpush.bf16.msra.mxu1 %v1794_v45  ;;  %v2141_v2 = vld [vmem:[%s2742_s23 + $0x4c] sm:$0xf]  ;;  %v1767_v3 = vld [vmem:[%s2742_s23 + $0x58] sm:$0xf0]  ;;  %v1762_v5 = vor.u32 %v2140_v61, %v1759_v63  ;;  %v1766_v6 = vor.u32 %v2143_v1, %v1765_v0  ;;  %v1741_v7 = vld [vmem:[%s2742_s23 + $0x20] sm:$0xf] }
  0x4a   : > { %766 = vmatpush.bf16.msra.mxu2 %v1798_v46  ;;  %780 = vmatpush.bf16.msra.mxu3 %v1802_v50  ;;  %v2138_v8 = vld [vmem:[%s2742_s23 + $0x2c] sm:$0xf0]  ;;  %v2136_v9 = vld [vmem:[%s2742_s23 + $0x24] sm:$0xf]  ;;  %v1770_v10 = vor.u32 %v2141_v2, %v1767_v3  ;;  %v1743_v11 = vld [vmem:[%s2742_s23 + $0x30] sm:$0xf0] }
  0x4b   : > { %v1749_v12 = vld [vmem:[%s2742_s23 + $0x28] sm:$0xf]  ;;  %v2139_v13 = vld [vmem:[%s2742_s23 + $0x34] sm:$0xf0]  ;;  %v2137_v14 = vld [vmem:[%s2742_s23 + $0x2c] sm:$0xf]  ;;  %v1742_v16 = vor.u32 %v2138_v8, %v1741_v7  ;;  %v1746_v17 = vor.u32 %v2136_v9, %v1743_v11 }
  0x4c   : > { %739 = vmatpush.bf16.msra.mxu0 %v1774_v56  ;;  %v1751_v15 = vld [vmem:[%s2742_s23 + $0x38] sm:$0xf0]  ;;  %v1750_v18 = vor.u32 %v2139_v13, %v1749_v12  ;;  %v1725_v19 = vld [vmem:[%s2742_s23] sm:$0xf]  ;;  %v2134_v20 = vld [vmem:[%s2742_s23 + $0xc] sm:$0xf0] }
  0x4d   : > { %753 = vmatpush.bf16.msra.mxu1 %v1778_v57  ;;  %v2132_v21 = vld [vmem:[%s2742_s23 + $0x4] sm:$0xf]  ;;  %v1754_v22 = vor.u32 %v2137_v14, %v1751_v15  ;;  %v1727_v23 = vld [vmem:[%s2742_s23 + $0x10] sm:$0xf0]  ;;  %v1733_v24 = vld [vmem:[%s2742_s23 + $0x8] sm:$0xf]  ;;  %v1726_v28 = vor.u32 %v2134_v20, %v1725_v19 }
  0x4e   : > { %767 = vmatpush.bf16.msra.mxu2 %v1782_v58  ;;  %781 = vmatpush.bf16.msra.mxu3 %v1786_v62  ;;  %v2135_v25 = vld [vmem:[%s2742_s23 + $0x14] sm:$0xf0]  ;;  %v2133_v26 = vld [vmem:[%s2742_s23 + $0xc] sm:$0xf]  ;;  %v1735_v27 = vld [vmem:[%s2742_s23 + $0x18] sm:$0xf0]  ;;  %v1730_v31 = vor.u32 %v2132_v21, %v1727_v23 }
  0x4f   : > { %v530_v29 = vld [vmem:[%s499_s11] sm:$0xff]  ;;  %v531_v30 = vld [vmem:[%s499_s11 + $0x8] sm:$0xff]  ;;  %v1734_v32 = vor.u32 %v2135_v25, %v1733_v24  ;;  %v1738_v33 = vor.u32 %v2133_v26, %v1735_v27  ;;  %p1851_p7 = scmp.ne.s32.totalorder %s2515_s10, 0 }
  0x50   : > { %740 = vmatpush.bf16.msra.mxu0 %v1758_v4  ;;  %v532_v34 = vpack.c.bf16 %v531_v30, %v530_v29  ;;  %v565_v35 = vld [vmem:[%s518_s15] sm:$0xf] }
  0x51   : > { %754 = vmatpush.bf16.msra.mxu1 %v1762_v5  ;;  %v567_v36 = vperm.slane %v565_v35, 0  ;;  %v568_v37 = vperm.slane %v565_v35, 1  ;;  %v569_v42 = vperm.slane %v565_v35, 2  ;;  %v570_v43 = vperm.slane %v565_v35, 3 }
  0x52   : > { %768 = vmatpush.bf16.msra.mxu2 %v1766_v6  ;;  %782 = vmatpush.bf16.msra.mxu3 %v1770_v10 }
  0x54   : > { %741 = vmatpush.bf16.msra.mxu0 %v1742_v16 }
  0x55   : > { %755 = vmatpush.bf16.msra.mxu1 %v1746_v17 }
  0x56   : > { %769 = vmatpush.bf16.msra.mxu2 %v1750_v18  ;;  %783 = vmatpush.bf16.msra.mxu3 %v1754_v22 }
  0x58   : > { %742 = vmatpush.bf16.msra.mxu0 %v1726_v28 }
  0x59   : > { %756 = vmatpush.bf16.msra.mxu1 %v1730_v31 }
  0x5a   : > { %770 = vmatpush.bf16.msra.mxu2 %v1734_v32  ;;  %784 = vmatpush.bf16.msra.mxu3 %v1738_v33 }
  0x5b   : > { %743 = vmatmul.bf16.vlgmr.msra.gmra.mxu0 %v532_v34 }
  0x5c   : > { %757 = vmatmul.bf16.vlgmr.msra.gmra.mxu1 %v532_v34 }
  0x5d   : > { %771 = vmatmul.bf16.vlgmr.msra.gmra.mxu2 %v532_v34  ;;  %785 = vmatmul.bf16.vlgmr.msra.gmra.mxu3 %v532_v34 }
  0xd8   : > { %v744_v38 = vpop.f32.mrf.mxu0 }
  0xd9   : > { %v2816_v39 = vadd.f32 %v744_v38, %v567_v36  ;;  %v758_v40 = vpop.f32.mrf.mxu1 }
  0xda   : > { %v2818_v41 = vadd.f32 %v758_v40, %v568_v37 }
  0xe0   : > { %v772_v44 = vpop.f32.mrf.mxu2  ;;  %v786_v46 = vpop.f32.mrf.mxu3 }
  0xe1   : > { %v2820_v45 = vadd.f32 %v772_v44, %v569_v42  ;;  %v746_v47 = vpop.f32.mrf.mxu0  ;;  %v2822_v48 = vadd.f32 %v786_v46, %v570_v43  ;;  %v760_v50 = vpop.f32.mrf.mxu1 }
  0xe2   : > { %v2824_v49 = vadd.f32 %v746_v47, %v567_v36  ;;  %v2826_v51 = vadd.f32 %v760_v50, %v568_v37 }
  0xe5   : > { %794 = sbr.rel (%p1851_p7) target bundleno = 413 (0x19d), region = 64 }
  0xe8   : > { %v774_v52 = vpop.f32.mrf.mxu2  ;;  %v788_v54 = vpop.f32.mrf.mxu3 }
  0xe9   : > { %v2828_v53 = vadd.f32 %v774_v52, %v569_v42  ;;  %v2830_v55 = vadd.f32 %v788_v54, %v570_v43 }
  0xea   : > { %v1970_v56 = vld [vmem:[%s2702_s27 + $0xe0] sm:$0xf]  ;;  %v2195_v57 = vld [vmem:[%s2702_s27 + $0xec] sm:$0xf0]  ;;  %v2193_v58 = vld [vmem:[%s2702_s27 + $0xe4] sm:$0xf] }
  0xeb   : > { %v1971_v59 = vor.u32 %v2195_v57, %v1970_v56  ;;  %v1972_v60 = vld [vmem:[%s2702_s27 + $0xf0] sm:$0xf0]  ;;  %v1978_v61 = vld [vmem:[%s2702_s27 + $0xe8] sm:$0xf]  ;;  %v2196_v62 = vld [vmem:[%s2702_s27 + $0xf4] sm:$0xf0] }
  0xec   : > { %v1975_v63 = vor.u32 %v2193_v58, %v1972_v60  ;;  %v1979_v0 = vor.u32 %v2196_v62, %v1978_v61  ;;  %v2194_v1 = vld [vmem:[%s2702_s27 + $0xec] sm:$0xf]  ;;  %v1980_v2 = vld [vmem:[%s2702_s27 + $0xf8] sm:$0xf0]  ;;  %v1954_v3 = vld [vmem:[%s2702_s27 + $0xc0] sm:$0xf] }
  0xed   : > { %995 = vmatpush.bf16.msra.mxu0 %v1971_v59  ;;  %v1983_v4 = vor.u32 %v2194_v1, %v1980_v2  ;;  %v2191_v5 = vld [vmem:[%s2702_s27 + $0xcc] sm:$0xf0]  ;;  %v2189_v6 = vld [vmem:[%s2702_s27 + $0xc4] sm:$0xf]  ;;  %v1956_v7 = vld [vmem:[%s2702_s27 + $0xd0] sm:$0xf0] }
  0xee   : > { %1009 = vmatpush.bf16.msra.mxu1 %v1975_v63  ;;  %1023 = vmatpush.bf16.msra.mxu2 %v1979_v0  ;;  %v1955_v8 = vor.u32 %v2191_v5, %v1954_v3  ;;  %v1959_v9 = vor.u32 %v2189_v6, %v1956_v7  ;;  %v1962_v10 = vld [vmem:[%s2702_s27 + $0xc8] sm:$0xf]  ;;  %v2192_v11 = vld [vmem:[%s2702_s27 + $0xd4] sm:$0xf0]  ;;  %v2190_v12 = vld [vmem:[%s2702_s27 + $0xcc] sm:$0xf] }
  0xef   : > { %1037 = vmatpush.bf16.msra.mxu3 %v1983_v4  ;;  %v1963_v13 = vor.u32 %v2192_v11, %v1962_v10  ;;  %v1964_v14 = vld [vmem:[%s2702_s27 + $0xd8] sm:$0xf0]  ;;  %v1938_v15 = vld [vmem:[%s2702_s27 + $0xa0] sm:$0xf]  ;;  %v2187_v16 = vld [vmem:[%s2702_s27 + $0xac] sm:$0xf0] }
  0xf0   : > { %v1967_v17 = vor.u32 %v2190_v12, %v1964_v14  ;;  %v2185_v18 = vld [vmem:[%s2702_s27 + $0xa4] sm:$0xf]  ;;  %v1940_v19 = vld [vmem:[%s2702_s27 + $0xb0] sm:$0xf0]  ;;  %v1946_v20 = vld [vmem:[%s2702_s27 + $0xa8] sm:$0xf]  ;;  %v1939_v21 = vor.u32 %v2187_v16, %v1938_v15 }
  0xf1   : > { %996 = vmatpush.bf16.msra.mxu0 %v1955_v8  ;;  %v2188_v22 = vld [vmem:[%s2702_s27 + $0xb4] sm:$0xf0]  ;;  %v2186_v23 = vld [vmem:[%s2702_s27 + $0xac] sm:$0xf]  ;;  %v1948_v24 = vld [vmem:[%s2702_s27 + $0xb8] sm:$0xf0]  ;;  %v1943_v25 = vor.u32 %v2185_v18, %v1940_v19 }
  0xf2   : > { %1010 = vmatpush.bf16.msra.mxu1 %v1959_v9  ;;  %1024 = vmatpush.bf16.msra.mxu2 %v1963_v13  ;;  %v1947_v26 = vor.u32 %v2188_v22, %v1946_v20  ;;  %v1922_v27 = vld [vmem:[%s2702_s27 + $0x80] sm:$0xf]  ;;  %v2183_v28 = vld [vmem:[%s2702_s27 + $0x8c] sm:$0xf0]  ;;  %v2181_v29 = vld [vmem:[%s2702_s27 + $0x84] sm:$0xf]  ;;  %v1951_v30 = vor.u32 %v2186_v23, %v1948_v24 }
  0xf3   : > { %1038 = vmatpush.bf16.msra.mxu3 %v1967_v17  ;;  %v1924_v31 = vld [vmem:[%s2702_s27 + $0x90] sm:$0xf0]  ;;  %v1930_v32 = vld [vmem:[%s2702_s27 + $0x88] sm:$0xf]  ;;  %v2184_v33 = vld [vmem:[%s2702_s27 + $0x94] sm:$0xf0]  ;;  %v1923_v36 = vor.u32 %v2183_v28, %v1922_v27 }
  0xf4   : > { %v2182_v34 = vld [vmem:[%s2702_s27 + $0x8c] sm:$0xf]  ;;  %v1932_v35 = vld [vmem:[%s2702_s27 + $0x98] sm:$0xf0]  ;;  %v1927_v37 = vor.u32 %v2181_v29, %v1924_v31  ;;  %v1931_v38 = vor.u32 %v2184_v33, %v1930_v32  ;;  %v1906_v40 = vld [vmem:[%s2702_s27 + $0x60] sm:$0xf] }
  0xf5   : > { %997 = vmatpush.bf16.msra.mxu0 %v1939_v21  ;;  %v2179_v42 = vld [vmem:[%s2702_s27 + $0x6c] sm:$0xf0]  ;;  %v2177_v43 = vld [vmem:[%s2702_s27 + $0x64] sm:$0xf]  ;;  %v1935_v44 = vor.u32 %v2182_v34, %v1932_v35  ;;  %v1908_v46 = vld [vmem:[%s2702_s27 + $0x70] sm:$0xf0] }
  0xf6   : > { %1011 = vmatpush.bf16.msra.mxu1 %v1943_v25  ;;  %1025 = vmatpush.bf16.msra.mxu2 %v1947_v26  ;;  %v1914_v47 = vld [vmem:[%s2702_s27 + $0x68] sm:$0xf]  ;;  %v2180_v50 = vld [vmem:[%s2702_s27 + $0x74] sm:$0xf0]  ;;  %v2178_v52 = vld [vmem:[%s2702_s27 + $0x6c] sm:$0xf]  ;;  %v1907_v56 = vor.u32 %v2179_v42, %v1906_v40  ;;  %v1911_v57 = vor.u32 %v2177_v43, %v1908_v46 }
  0xf7   : > { %1039 = vmatpush.bf16.msra.mxu3 %v1951_v30  ;;  %v1916_v54 = vld [vmem:[%s2702_s27 + $0x78] sm:$0xf0]  ;;  %v1915_v58 = vor.u32 %v2180_v50, %v1914_v47  ;;  %v1890_v59 = vld [vmem:[%s2702_s27 + $0x40] sm:$0xf]  ;;  %v2175_v60 = vld [vmem:[%s2702_s27 + $0x4c] sm:$0xf0] }
  0xf8   : > { %v2173_v61 = vld [vmem:[%s2702_s27 + $0x44] sm:$0xf]  ;;  %v1919_v62 = vor.u32 %v2178_v52, %v1916_v54  ;;  %v1892_v63 = vld [vmem:[%s2702_s27 + $0x50] sm:$0xf0]  ;;  %v1898_v0 = vld [vmem:[%s2702_s27 + $0x48] sm:$0xf]  ;;  %v1891_v4 = vor.u32 %v2175_v60, %v1890_v59 }
  0xf9   : > { %998 = vmatpush.bf16.msra.mxu0 %v1923_v36  ;;  %v2176_v1 = vld [vmem:[%s2702_s27 + $0x54] sm:$0xf0]  ;;  %v2174_v2 = vld [vmem:[%s2702_s27 + $0x4c] sm:$0xf]  ;;  %v1900_v3 = vld [vmem:[%s2702_s27 + $0x58] sm:$0xf0]  ;;  %v1895_v5 = vor.u32 %v2173_v61, %v1892_v63 }
  0xfa   : > { %1012 = vmatpush.bf16.msra.mxu1 %v1927_v37  ;;  %1026 = vmatpush.bf16.msra.mxu2 %v1931_v38  ;;  %v1899_v6 = vor.u32 %v2176_v1, %v1898_v0  ;;  %v1874_v7 = vld [vmem:[%s2702_s27 + $0x20] sm:$0xf]  ;;  %v2171_v8 = vld [vmem:[%s2702_s27 + $0x2c] sm:$0xf0]  ;;  %v2169_v9 = vld [vmem:[%s2702_s27 + $0x24] sm:$0xf]  ;;  %v1903_v10 = vor.u32 %v2174_v2, %v1900_v3 }
  0xfb   : > { %1040 = vmatpush.bf16.msra.mxu3 %v1935_v44  ;;  %v1876_v11 = vld [vmem:[%s2702_s27 + $0x30] sm:$0xf0]  ;;  %v1882_v12 = vld [vmem:[%s2702_s27 + $0x28] sm:$0xf]  ;;  %v2172_v13 = vld [vmem:[%s2702_s27 + $0x34] sm:$0xf0]  ;;  %v1875_v16 = vor.u32 %v2171_v8, %v1874_v7 }
  0xfc   : > { %v2170_v14 = vld [vmem:[%s2702_s27 + $0x2c] sm:$0xf]  ;;  %v1884_v15 = vld [vmem:[%s2702_s27 + $0x38] sm:$0xf0]  ;;  %v1879_v17 = vor.u32 %v2169_v9, %v1876_v11  ;;  %v1883_v18 = vor.u32 %v2172_v13, %v1882_v12  ;;  %v1858_v19 = vld [vmem:[%s2702_s27] sm:$0xf] }
  0xfd   : > { %999 = vmatpush.bf16.msra.mxu0 %v1907_v56  ;;  %v2167_v20 = vld [vmem:[%s2702_s27 + $0xc] sm:$0xf0]  ;;  %v2165_v21 = vld [vmem:[%s2702_s27 + $0x4] sm:$0xf]  ;;  %v1887_v22 = vor.u32 %v2170_v14, %v1884_v15  ;;  %v1860_v23 = vld [vmem:[%s2702_s27 + $0x10] sm:$0xf0] }
  0xfe   : > { %1013 = vmatpush.bf16.msra.mxu1 %v1911_v57  ;;  %1027 = vmatpush.bf16.msra.mxu2 %v1915_v58  ;;  %v1866_v24 = vld [vmem:[%s2702_s27 + $0x8] sm:$0xf]  ;;  %v2168_v25 = vld [vmem:[%s2702_s27 + $0x14] sm:$0xf0]  ;;  %v2166_v26 = vld [vmem:[%s2702_s27 + $0xc] sm:$0xf]  ;;  %v1859_v28 = vor.u32 %v2167_v20, %v1858_v19  ;;  %v1863_v29 = vor.u32 %v2165_v21, %v1860_v23 }
  0xff   : > { %1041 = vmatpush.bf16.msra.mxu3 %v1919_v62  ;;  %v1868_v27 = vld [vmem:[%s2702_s27 + $0x18] sm:$0xf0]  ;;  %v1867_v30 = vor.u32 %v2168_v25, %v1866_v24 }
 0x100   : > { %v1871_v31 = vor.u32 %v2166_v26, %v1868_v27  ;;  %v2164_v32 = vld [vmem:[%s3106_s0] sm:$0xff] }
 0x101   : > { %1000 = vmatpush.bf16.msra.mxu0 %v1891_v4 }
 0x102   : > { %1014 = vmatpush.bf16.msra.mxu1 %v1895_v5  ;;  %1028 = vmatpush.bf16.msra.mxu2 %v1899_v6 }
 0x103   : > { %1042 = vmatpush.bf16.msra.mxu3 %v1903_v10 }
 0x105   : > { %1001 = vmatpush.bf16.msra.mxu0 %v1875_v16 }
 0x106   : > { %1015 = vmatpush.bf16.msra.mxu1 %v1879_v17  ;;  %1029 = vmatpush.bf16.msra.mxu2 %v1883_v18 }
 0x107   : > { %1043 = vmatpush.bf16.msra.mxu3 %v1887_v22 }
 0x109   : > { %1002 = vmatpush.bf16.msra.mxu0 %v1859_v28 }
 0x10a   : > { %1016 = vmatpush.bf16.msra.mxu1 %v1863_v29  ;;  %1030 = vmatpush.bf16.msra.mxu2 %v1867_v30 }
 0x10b   : > { %1044 = vmatpush.bf16.msra.mxu3 %v1871_v31 }
 0x10c   : > { %1003 = vmatmul.bf16.vlgmr.msra.gmra.mxu0 %v2164_v32 }
 0x10d   : > { %1017 = vmatmul.bf16.vlgmr.msra.gmra.mxu1 %v2164_v32  ;;  %1031 = vmatmul.bf16.vlgmr.msra.gmra.mxu2 %v2164_v32 }
 0x10e   : > { %1045 = vmatmul.bf16.vlgmr.msra.gmra.mxu3 %v2164_v32 }
 0x189   : > { %v1004_v33 = vpop.f32.mrf.mxu0 }
 0x18a   : > { %v1051_v34 = vadd.f32 %v1004_v33, %v2816_v39  ;;  %v1018_v35 = vpop.f32.mrf.mxu1 }
 0x18b   : > { %v1052_v36 = vadd.f32 %v1018_v35, %v2818_v41 }
 0x18c   : > { %1062 = vst [vmem:[#allocation3 + $0x30] sm:$0xff] %v1051_v34 }
 0x18d   : > { %1063 = vst [vmem:[#allocation3] sm:$0xff] %v1052_v36 }
 0x190   : > { %v1032_v37 = vpop.f32.mrf.mxu2 }
 0x191   : > { %v1053_v38 = vadd.f32 %v1032_v37, %v2820_v45  ;;  %v1046_v40 = vpop.f32.mrf.mxu3  ;;  %v1006_v42 = vpop.f32.mrf.mxu0 }
 0x192   : > { %v1054_v43 = vadd.f32 %v1046_v40, %v2822_v48  ;;  %v1055_v44 = vadd.f32 %v1006_v42, %v2824_v49  ;;  %v1020_v46 = vpop.f32.mrf.mxu1 }
 0x193   : > { %1064 = vst [vmem:[#allocation3 + $0x18] sm:$0xff] %v1053_v38  ;;  %v1056_v47 = vadd.f32 %v1020_v46, %v2826_v51 }
 0x194   : > { %1065 = vst [vmem:[#allocation3 + $0x10] sm:$0xff] %v1054_v43 }
 0x195   : > { %1066 = vst [vmem:[#allocation3 + $0x8] sm:$0xff] %v1055_v44 }
 0x196   : > { %1067 = vst [vmem:[#allocation3 + $0x20] sm:$0xff] %v1056_v47 }
 0x198   : > { %v1034_v50 = vpop.f32.mrf.mxu2 }
 0x199   : > { %v1057_v52 = vadd.f32 %v1034_v50, %v2828_v53  ;;  %v1048_v54 = vpop.f32.mrf.mxu3 }
 0x19a   : > { %v1058_v56 = vadd.f32 %v1048_v54, %v2830_v55 }
 0x19b   : > { %1068 = vst [vmem:[#allocation3 + $0x28] sm:$0xff] %v1057_v52 }
 0x19c   : > { %1069 = vst [vmem:[#allocation3 + $0x38] sm:$0xff] %v1058_v56 }
 0x19d PF: > { %p1984_p9 = scmp.le.s32.totalorder %s2515_s10, 0 }
 0x19f   : > { %1073 = sbr.rel (%p1984_p9) target bundleno = 599 (0x257), region = 68 }
 0x1a4   : > { %v2103_v57 = vld [vmem:[%s2711_s24 + $0xe0] sm:$0xf]  ;;  %v2228_v58 = vld [vmem:[%s2711_s24 + $0xec] sm:$0xf0]  ;;  %v2226_v59 = vld [vmem:[%s2711_s24 + $0xe4] sm:$0xf] }
 0x1a5   : > { %v2104_v60 = vor.u32 %v2228_v58, %v2103_v57  ;;  %v2105_v61 = vld [vmem:[%s2711_s24 + $0xf0] sm:$0xf0]  ;;  %v2111_v62 = vld [vmem:[%s2711_s24 + $0xe8] sm:$0xf]  ;;  %v2229_v63 = vld [vmem:[%s2711_s24 + $0xf4] sm:$0xf0] }
 0x1a6   : > { %v2108_v0 = vor.u32 %v2226_v59, %v2105_v61  ;;  %v2112_v1 = vor.u32 %v2229_v63, %v2111_v62  ;;  %v2227_v2 = vld [vmem:[%s2711_s24 + $0xec] sm:$0xf]  ;;  %v2113_v3 = vld [vmem:[%s2711_s24 + $0xf8] sm:$0xf0]  ;;  %v2087_v4 = vld [vmem:[%s2711_s24 + $0xc0] sm:$0xf] }
 0x1a7   : > { %1274 = vmatpush.bf16.msra.mxu0 %v2104_v60  ;;  %v2116_v5 = vor.u32 %v2227_v2, %v2113_v3  ;;  %v2224_v6 = vld [vmem:[%s2711_s24 + $0xcc] sm:$0xf0]  ;;  %v2222_v7 = vld [vmem:[%s2711_s24 + $0xc4] sm:$0xf]  ;;  %v2089_v8 = vld [vmem:[%s2711_s24 + $0xd0] sm:$0xf0] }
 0x1a8   : > { %1288 = vmatpush.bf16.msra.mxu1 %v2108_v0  ;;  %1302 = vmatpush.bf16.msra.mxu2 %v2112_v1  ;;  %v2088_v9 = vor.u32 %v2224_v6, %v2087_v4  ;;  %v2092_v10 = vor.u32 %v2222_v7, %v2089_v8  ;;  %v2095_v11 = vld [vmem:[%s2711_s24 + $0xc8] sm:$0xf]  ;;  %v2225_v12 = vld [vmem:[%s2711_s24 + $0xd4] sm:$0xf0]  ;;  %v2223_v13 = vld [vmem:[%s2711_s24 + $0xcc] sm:$0xf] }
 0x1a9   : > { %1316 = vmatpush.bf16.msra.mxu3 %v2116_v5  ;;  %v2096_v14 = vor.u32 %v2225_v12, %v2095_v11  ;;  %v2097_v15 = vld [vmem:[%s2711_s24 + $0xd8] sm:$0xf0]  ;;  %v2071_v16 = vld [vmem:[%s2711_s24 + $0xa0] sm:$0xf]  ;;  %v2220_v17 = vld [vmem:[%s2711_s24 + $0xac] sm:$0xf0] }
 0x1aa   : > { %v2100_v18 = vor.u32 %v2223_v13, %v2097_v15  ;;  %v2218_v19 = vld [vmem:[%s2711_s24 + $0xa4] sm:$0xf]  ;;  %v2073_v20 = vld [vmem:[%s2711_s24 + $0xb0] sm:$0xf0]  ;;  %v2079_v21 = vld [vmem:[%s2711_s24 + $0xa8] sm:$0xf]  ;;  %v2072_v22 = vor.u32 %v2220_v17, %v2071_v16 }
 0x1ab   : > { %1275 = vmatpush.bf16.msra.mxu0 %v2088_v9  ;;  %v2221_v23 = vld [vmem:[%s2711_s24 + $0xb4] sm:$0xf0]  ;;  %v2219_v24 = vld [vmem:[%s2711_s24 + $0xac] sm:$0xf]  ;;  %v2081_v25 = vld [vmem:[%s2711_s24 + $0xb8] sm:$0xf0]  ;;  %v2076_v26 = vor.u32 %v2218_v19, %v2073_v20 }
 0x1ac   : > { %1289 = vmatpush.bf16.msra.mxu1 %v2092_v10  ;;  %1303 = vmatpush.bf16.msra.mxu2 %v2096_v14  ;;  %v2080_v27 = vor.u32 %v2221_v23, %v2079_v21  ;;  %v2055_v28 = vld [vmem:[%s2711_s24 + $0x80] sm:$0xf]  ;;  %v2216_v29 = vld [vmem:[%s2711_s24 + $0x8c] sm:$0xf0]  ;;  %v2214_v30 = vld [vmem:[%s2711_s24 + $0x84] sm:$0xf]  ;;  %v2084_v31 = vor.u32 %v2219_v24, %v2081_v25 }
 0x1ad   : > { %1317 = vmatpush.bf16.msra.mxu3 %v2100_v18  ;;  %v2057_v32 = vld [vmem:[%s2711_s24 + $0x90] sm:$0xf0]  ;;  %v2063_v33 = vld [vmem:[%s2711_s24 + $0x88] sm:$0xf]  ;;  %v2217_v34 = vld [vmem:[%s2711_s24 + $0x94] sm:$0xf0]  ;;  %v2056_v37 = vor.u32 %v2216_v29, %v2055_v28 }
 0x1ae   : > { %v2215_v35 = vld [vmem:[%s2711_s24 + $0x8c] sm:$0xf]  ;;  %v2065_v36 = vld [vmem:[%s2711_s24 + $0x98] sm:$0xf0]  ;;  %v2060_v38 = vor.u32 %v2214_v30, %v2057_v32  ;;  %v2064_v40 = vor.u32 %v2217_v34, %v2063_v33  ;;  %v2039_v42 = vld [vmem:[%s2711_s24 + $0x60] sm:$0xf] }
 0x1af   : > { %1276 = vmatpush.bf16.msra.mxu0 %v2072_v22  ;;  %v2212_v43 = vld [vmem:[%s2711_s24 + $0x6c] sm:$0xf0]  ;;  %v2210_v44 = vld [vmem:[%s2711_s24 + $0x64] sm:$0xf]  ;;  %v2068_v46 = vor.u32 %v2215_v35, %v2065_v36  ;;  %v2041_v47 = vld [vmem:[%s2711_s24 + $0x70] sm:$0xf0] }
 0x1b0   : > { %1290 = vmatpush.bf16.msra.mxu1 %v2076_v26  ;;  %1304 = vmatpush.bf16.msra.mxu2 %v2080_v27  ;;  %v2047_v50 = vld [vmem:[%s2711_s24 + $0x68] sm:$0xf]  ;;  %v2213_v52 = vld [vmem:[%s2711_s24 + $0x74] sm:$0xf0]  ;;  %v2211_v54 = vld [vmem:[%s2711_s24 + $0x6c] sm:$0xf]  ;;  %v2040_v57 = vor.u32 %v2212_v43, %v2039_v42  ;;  %v2044_v58 = vor.u32 %v2210_v44, %v2041_v47 }
 0x1b1   : > { %1318 = vmatpush.bf16.msra.mxu3 %v2084_v31  ;;  %v2049_v56 = vld [vmem:[%s2711_s24 + $0x78] sm:$0xf0]  ;;  %v2048_v59 = vor.u32 %v2213_v52, %v2047_v50  ;;  %v2023_v60 = vld [vmem:[%s2711_s24 + $0x40] sm:$0xf]  ;;  %v2208_v61 = vld [vmem:[%s2711_s24 + $0x4c] sm:$0xf0] }
 0x1b2   : > { %v2206_v62 = vld [vmem:[%s2711_s24 + $0x44] sm:$0xf]  ;;  %v2052_v63 = vor.u32 %v2211_v54, %v2049_v56  ;;  %v2025_v0 = vld [vmem:[%s2711_s24 + $0x50] sm:$0xf0]  ;;  %v2031_v1 = vld [vmem:[%s2711_s24 + $0x48] sm:$0xf]  ;;  %v2024_v5 = vor.u32 %v2208_v61, %v2023_v60 }
 0x1b3   : > { %1277 = vmatpush.bf16.msra.mxu0 %v2056_v37  ;;  %v2209_v2 = vld [vmem:[%s2711_s24 + $0x54] sm:$0xf0]  ;;  %v2207_v3 = vld [vmem:[%s2711_s24 + $0x4c] sm:$0xf]  ;;  %v2033_v4 = vld [vmem:[%s2711_s24 + $0x58] sm:$0xf0]  ;;  %v2028_v6 = vor.u32 %v2206_v62, %v2025_v0 }
 0x1b4   : > { %1291 = vmatpush.bf16.msra.mxu1 %v2060_v38  ;;  %1305 = vmatpush.bf16.msra.mxu2 %v2064_v40  ;;  %v2032_v7 = vor.u32 %v2209_v2, %v2031_v1  ;;  %v2007_v8 = vld [vmem:[%s2711_s24 + $0x20] sm:$0xf]  ;;  %v2204_v9 = vld [vmem:[%s2711_s24 + $0x2c] sm:$0xf0]  ;;  %v2202_v10 = vld [vmem:[%s2711_s24 + $0x24] sm:$0xf]  ;;  %v2036_v11 = vor.u32 %v2207_v3, %v2033_v4 }
 0x1b5   : > { %1319 = vmatpush.bf16.msra.mxu3 %v2068_v46  ;;  %v2009_v12 = vld [vmem:[%s2711_s24 + $0x30] sm:$0xf0]  ;;  %v2015_v13 = vld [vmem:[%s2711_s24 + $0x28] sm:$0xf]  ;;  %v2205_v14 = vld [vmem:[%s2711_s24 + $0x34] sm:$0xf0]  ;;  %v2008_v17 = vor.u32 %v2204_v9, %v2007_v8 }
 0x1b6   : > { %v2203_v15 = vld [vmem:[%s2711_s24 + $0x2c] sm:$0xf]  ;;  %v2017_v16 = vld [vmem:[%s2711_s24 + $0x38] sm:$0xf0]  ;;  %v2012_v18 = vor.u32 %v2202_v10, %v2009_v12  ;;  %v2016_v19 = vor.u32 %v2205_v14, %v2015_v13  ;;  %v1991_v20 = vld [vmem:[%s2711_s24] sm:$0xf] }
 0x1b7   : > { %1278 = vmatpush.bf16.msra.mxu0 %v2040_v57  ;;  %v2200_v21 = vld [vmem:[%s2711_s24 + $0xc] sm:$0xf0]  ;;  %v2198_v22 = vld [vmem:[%s2711_s24 + $0x4] sm:$0xf]  ;;  %v2020_v23 = vor.u32 %v2203_v15, %v2017_v16  ;;  %v1993_v24 = vld [vmem:[%s2711_s24 + $0x10] sm:$0xf0] }
 0x1b8   : > { %1292 = vmatpush.bf16.msra.mxu1 %v2044_v58  ;;  %1306 = vmatpush.bf16.msra.mxu2 %v2048_v59  ;;  %v1999_v25 = vld [vmem:[%s2711_s24 + $0x8] sm:$0xf]  ;;  %v2201_v26 = vld [vmem:[%s2711_s24 + $0x14] sm:$0xf0]  ;;  %v2199_v27 = vld [vmem:[%s2711_s24 + $0xc] sm:$0xf]  ;;  %v1992_v29 = vor.u32 %v2200_v21, %v1991_v20  ;;  %v1996_v30 = vor.u32 %v2198_v22, %v1993_v24 }
 0x1b9   : > { %1320 = vmatpush.bf16.msra.mxu3 %v2052_v63  ;;  %v2001_v28 = vld [vmem:[%s2711_s24 + $0x18] sm:$0xf0]  ;;  %v2000_v31 = vor.u32 %v2201_v26, %v1999_v25 }
 0x1ba   : > { %v2004_v32 = vor.u32 %v2199_v27, %v2001_v28  ;;  %v2197_v33 = vld [vmem:[#allocation2] sm:$0xff] }
 0x1bb   : > { %1279 = vmatpush.bf16.msra.mxu0 %v2024_v5 }
 0x1bc   : > { %1293 = vmatpush.bf16.msra.mxu1 %v2028_v6  ;;  %1307 = vmatpush.bf16.msra.mxu2 %v2032_v7 }
 0x1bd   : > { %1321 = vmatpush.bf16.msra.mxu3 %v2036_v11 }
 0x1bf   : > { %1280 = vmatpush.bf16.msra.mxu0 %v2008_v17 }
 0x1c0   : > { %1294 = vmatpush.bf16.msra.mxu1 %v2012_v18  ;;  %1308 = vmatpush.bf16.msra.mxu2 %v2016_v19 }
 0x1c1   : > { %1322 = vmatpush.bf16.msra.mxu3 %v2020_v23 }
 0x1c3   : > { %1281 = vmatpush.bf16.msra.mxu0 %v1992_v29 }
 0x1c4   : > { %1295 = vmatpush.bf16.msra.mxu1 %v1996_v30  ;;  %1309 = vmatpush.bf16.msra.mxu2 %v2000_v31 }
 0x1c5   : > { %1323 = vmatpush.bf16.msra.mxu3 %v2004_v32 }
 0x1c6   : > { %1282 = vmatmul.bf16.vlgmr.msra.gmra.mxu0 %v2197_v33 }
 0x1c7   : > { %1296 = vmatmul.bf16.vlgmr.msra.gmra.mxu1 %v2197_v33  ;;  %1310 = vmatmul.bf16.vlgmr.msra.gmra.mxu2 %v2197_v33 }
 0x1c8   : > { %1324 = vmatmul.bf16.vlgmr.msra.gmra.mxu3 %v2197_v33 }
 0x243   : > { %v1283_v34 = vpop.f32.mrf.mxu0 }
 0x244   : > { %v1330_v35 = vadd.f32 %v1283_v34, %v2816_v39  ;;  %v1297_v36 = vpop.f32.mrf.mxu1 }
 0x245   : > { %v1331_v37 = vadd.f32 %v1297_v36, %v2818_v41 }
 0x246   : > { %1341 = vst [vmem:[#allocation3 + $0x30] sm:$0xff] %v1330_v35 }
 0x247   : > { %1342 = vst [vmem:[#allocation3] sm:$0xff] %v1331_v37 }
 0x24a   : > { %v1311_v38 = vpop.f32.mrf.mxu2 }
 0x24b   : > { %v1332_v40 = vadd.f32 %v1311_v38, %v2820_v45  ;;  %v1325_v42 = vpop.f32.mrf.mxu3  ;;  %v1285_v43 = vpop.f32.mrf.mxu0 }
 0x24c   : > { %v1333_v44 = vadd.f32 %v1325_v42, %v2822_v48  ;;  %v1334_v46 = vadd.f32 %v1285_v43, %v2824_v49  ;;  %v1299_v47 = vpop.f32.mrf.mxu1 }
 0x24d   : > { %1343 = vst [vmem:[#allocation3 + $0x18] sm:$0xff] %v1332_v40  ;;  %v1335_v50 = vadd.f32 %v1299_v47, %v2826_v51 }
 0x24e   : > { %1344 = vst [vmem:[#allocation3 + $0x10] sm:$0xff] %v1333_v44 }
 0x24f   : > { %1345 = vst [vmem:[#allocation3 + $0x8] sm:$0xff] %v1334_v46 }
 0x250   : > { %1346 = vst [vmem:[#allocation3 + $0x20] sm:$0xff] %v1335_v50 }
 0x252   : > { %v1313_v39 = vpop.f32.mrf.mxu2 }
 0x253   : > { %v1336_v41 = vadd.f32 %v1313_v39, %v2828_v53  ;;  %v1327_v52 = vpop.f32.mrf.mxu3 }
 0x254   : > { %v1337_v54 = vadd.f32 %v1327_v52, %v2830_v55 }
 0x255   : > { %1347 = vst [vmem:[#allocation3 + $0x28] sm:$0xff] %v1336_v41 }
 0x256   : > { %1348 = vst [vmem:[#allocation3 + $0x38] sm:$0xff] %v1337_v54 }
 0x257 PF: > { %v1353_v45 = vld [vmem:[#allocation3 + $0x30] sm:$0xff]  ;;  %v1354_v48 = vld [vmem:[#allocation3] sm:$0xff]  ;;  %v1357_v59 = vld [vmem:[#allocation3 + $0x8] sm:$0xff] }
 0x258   : > { %v1356_v56 = vld [vmem:[#allocation3 + $0x10] sm:$0xff]  ;;  %v2117_v49 = vmul.f32 -1.442695, %v1353_v45  ;;  %v2119_v57 = vmul.f32 -1.442695, %v1354_v48  ;;  %v1358_v51 = vld [vmem:[#allocation3 + $0x20] sm:$0xff] }
 0x259   : > { %v2121_v58 = vmul.f32 -1.442695, %v1356_v56  ;;  %v2118_v60 = vmul.f32 -1.442695, %v1357_v59  ;;  %v2120_v61 = vmul.f32 -1.442695, %v1358_v51 }
 0x25a   : > { %2326 = vpow2.f32 %v2117_v49  ;;  %v1355_v2 = vld [vmem:[#allocation3 + $0x18] sm:$0xff] }
 0x25b   : > { %2328 = vpow2.f32 %v2119_v57  ;;  %v1477_v45 = vld [vmem:[%s2728_s25] sm:$0xff] }
 0x25c   : > { %2330 = vpow2.f32 %v2121_v58  ;;  %v1359_v5 = vld [vmem:[#allocation3 + $0x28] sm:$0xff] }
 0x25d   : > { %v1360_v62 = vld [vmem:[#allocation3 + $0x38] sm:$0xff]  ;;  %2332 = vpow2.f32 %v2118_v60 }
 0x25e   : > { %2334 = vpow2.f32 %v2120_v61  ;;  %v2122_v53 = vmul.f32 -1.442695, %v1360_v62 }
 0x260   : > { %v2327_v55 = vpop.eup %2326  ;;  %2336 = vpow2.f32 %v2122_v53 }
 0x261   : > { %v2329_v63 = vpop.eup %2328  ;;  %v1367_v0 = vadd.f32 1.0, %v2327_v55 }
 0x262   : > { %v2331_v1 = vpop.eup %2330  ;;  %v1405_v3 = vadd.f32 1.0, %v2329_v63 }
 0x263   : > { %v2333_v4 = vpop.eup %2332  ;;  %2338 = vrcp.f32 %v1367_v0  ;;  %v2981_v7 = vadd.f32 1.0, %v2331_v1  ;;  %v1378_v9 = vand.u32 2147483647, %v1367_v0  ;;  %v1380_v10 = vand.u32 2147483648, %v1367_v0 }
 0x264   : > { %v2335_v6 = vpop.eup %2334  ;;  %2340 = vrcp.f32 %v1405_v3  ;;  %v2983_v8 = vadd.f32 1.0, %v2333_v4  ;;  %v1416_v12 = vand.u32 2147483647, %v1405_v3  ;;  %v1418_v13 = vand.u32 2147483648, %v1405_v3 }
 0x265   : > { %2342 = vtanh.f32 %v1355_v2  ;;  %v2985_v11 = vadd.f32 1.0, %v2335_v6  ;;  %vm1374_vm0 = vweird.f32 %v1367_v0  ;;  %vm2990_vm1 = vcmp.eq.f32.partialorder %v1378_v9, 8.507059e+37 }
 0x266   : > { %2344 = vtanh.f32 %v1359_v5  ;;  %v2337_v14 = vpop.eup %2336  ;;  %v1381_v19 = vor.u32 1.1754944e-38, %v1380_v10  ;;  %vm1412_vm2 = vweird.f32 %v1405_v3  ;;  %vm2994_vm3 = vcmp.eq.f32.partialorder %v1416_v12, 8.507059e+37 }
 0x267   : > { %2346 = vrcp.f32 %v2981_v7  ;;  %v1419_v23 = vor.u32 1.1754944e-38, %v1418_v13  ;;  %v1393_v24 = vand.u32 2147483647, %v2983_v8  ;;  %vm1452_vm5 = vweird.f32 %v2981_v7 }
 0x268   : > { %2348 = vrcp.f32 %v2983_v8  ;;  %v3002_v27 = vadd.f32 1.0, %v2337_v14  ;;  %v1458_v30 = vand.u32 2147483648, %v2981_v7  ;;  %vm1389_vm7 = vweird.f32 %v2983_v8 }
 0x269   : > { %v2339_v15 = vpop.eup %2338  ;;  %2350 = vrcp.f32 %v2985_v11  ;;  %v1395_v34 = vand.u32 2147483648, %v2983_v8  ;;  %vm3018_vm9 = vcmp.eq.f32.partialorder %v1393_v24, 8.507059e+37  ;;  %vm1427_vm10 = vweird.f32 %v2985_v11 }
 0x26a   : > { %v2341_v16 = vpop.eup %2340  ;;  %v1370_v17 = vmul.f32 %v2339_v15, %v1367_v0  ;;  %vm1375_vm4 = vweird.f32 %v2339_v15  ;;  %2352 = vrcp.f32 %v3002_v27  ;;  %v1431_v47 = vand.u32 2147483647, %v2985_v11 }
 0x26b   : > { %v2343_v20 = vpop.eup %2342  ;;  %v1408_v21 = vmul.f32 %v2341_v16, %v1405_v3  ;;  %vm1413_vm6 = vweird.f32 %v2341_v16  ;;  %vm3013_vm8 = vmor %vm1374_vm0, %vm1375_vm4  ;;  %v1433_v41 = vand.u32 2147483648, %v2985_v11  ;;  %v1396_v58 = vor.u32 1.1754944e-38, %v1395_v34 }
 0x26c   : > { %v2999_v25 = vpop.eup %2344  ;;  %v1371_v26 = vsub.f32 1.0, %v1370_v17  ;;  %vm3025_vm11 = vmor %vm1412_vm2, %vm1413_vm6  ;;  %v1456_v3 = vand.u32 2147483647, %v2981_v7  ;;  %v1459_v6 = vor.u32 1.1754944e-38, %v1458_v30  ;;  %v1473_v17 = vand.u32 2147483648, %v3002_v27 }
 0x26d   : > { %v3004_v28 = vpop.eup %2346  ;;  %v1409_v29 = vsub.f32 1.0, %v1408_v21  ;;  %v1434_v0 = vor.u32 1.1754944e-38, %v1433_v41 }
 0x26e   : > { %v2349_v31 = vpop.eup %2348  ;;  %v1372_v32 = vmul.f32 %v2339_v15, %v1371_v26  ;;  %v1448_v33 = vmul.f32 %v3004_v28, %v2981_v7  ;;  %vm1453_vm14 = vweird.f32 %v3004_v28 }
 0x26f   : > { %v2351_v35 = vpop.eup %2350  ;;  %v1410_v37 = vmul.f32 %v2341_v16, %v1409_v29  ;;  %v1385_v38 = vmul.f32 %v2349_v31, %v2983_v8  ;;  %vm1390_vm12 = vweird.f32 %v2349_v31  ;;  %vm3061_vm2 = vmor %vm1452_vm5, %vm1453_vm14  ;;  %vm1457_vm5 = vcmp.eq.f32.partialorder %v1456_v3, 8.507059e+37 }
 0x270   : > { %v1373_v42 = vadd.f32 %v2339_v15, %v1372_v32  ;;  %v1449_v44 = vsub.f32 1.0, %v1448_v33  ;;  %v1423_v46 = vmul.f32 %v2351_v35, %v2985_v11  ;;  %vm1428_vm13 = vweird.f32 %v2351_v35  ;;  %v2353_v59 = vpop.eup %2352  ;;  %vm3046_vm15 = vmor %vm1389_vm7, %vm1390_vm12  ;;  %v1478_v11 = vld [vmem:[%s2728_s25 + $0x8] sm:$0xff] }
 0x271   : > { %v1411_v50 = vadd.f32 %v2341_v16, %v1410_v37  ;;  %v1386_v39 = vsub.f32 1.0, %v1385_v38  ;;  %vm3052_vm0 = vmor %vm1427_vm10, %vm1428_vm13  ;;  %v1463_v1 = vmul.f32 %v2353_v59, %v3002_v27  ;;  %vm1468_vm4 = vweird.f32 %v2353_v59 }
 0x272   : > { %v1377_v52 = vsel %vm3013_vm8, %v2339_v15, %v1373_v42  ;;  %v1450_v54 = vmul.f32 %v3004_v28, %v1449_v44  ;;  %v1424_v48 = vsub.f32 1.0, %v1423_v46 }
 0x273   : > { %v1382_v56 = vsel %vm2990_vm1, %v1381_v19, %v1377_v52  ;;  %v1415_v49 = vsel %vm3025_vm11, %v2341_v16, %v1411_v50  ;;  %v1387_v57 = vmul.f32 %v2349_v31, %v1386_v39  ;;  %vm1432_vm1 = vcmp.eq.f32.partialorder %v1431_v47, 8.507059e+37 }
 0x274   : > { %v1420_v51 = vsel %vm2994_vm3, %v1419_v23, %v1415_v49  ;;  %v1481_v60 = vmul.f32 %v2343_v20, %v1382_v56  ;;  %v1425_v62 = vmul.f32 %v2351_v35, %v1424_v48  ;;  %v1451_v2 = vadd.f32 %v3004_v28, %v1450_v54 }
 0x275   : > { %v1479_v53 = vmul.f32 %v1477_v45, %v1420_v51  ;;  %v1388_v55 = vadd.f32 %v2349_v31, %v1387_v57  ;;  %v1464_v10 = vsub.f32 1.0, %v1463_v1  ;;  %vm1467_vm3 = vweird.f32 %v3002_v27 }
 0x276   : > { %v1426_v4 = vadd.f32 %v2351_v35, %v1425_v62  ;;  %v1455_v16 = vsel %vm3061_vm2, %v3004_v28, %v1451_v2  ;;  %v1471_v20 = vand.u32 2147483647, %v3002_v27  ;;  %vm1469_vm6 = vmor %vm1467_vm3, %vm1468_vm4  ;;  %v1474_v23 = vor.u32 1.1754944e-38, %v1473_v17 }
 0x277   : > { %v1483_v8 = vadd.f32 %v1481_v60, %v1479_v53  ;;  %v1392_v9 = vsel %vm3046_vm15, %v2349_v31, %v1388_v55  ;;  %v1465_v14 = vmul.f32 %v2353_v59, %v1464_v10  ;;  %v1460_v22 = vsel %vm1457_vm5, %v1459_v6, %v1455_v16 }
 0x278   : > { %v1397_v12 = vsel %vm3018_vm9, %v1396_v58, %v1392_v9  ;;  %v1430_v13 = vsel %vm3052_vm0, %v2351_v35, %v1426_v4  ;;  %vm1472_vm7 = vcmp.eq.f32.partialorder %v1471_v20, 8.507059e+37 }
 0x279   : > { %2354 = vtanh.f32 %v1483_v8  ;;  %1491 = vst [vmem:[%s2740_s26] sm:$0xff] %v1483_v8  ;;  %v1435_v7 = vsel %vm1432_vm1, %v1434_v0, %v1430_v13  ;;  %v1482_v15 = vmul.f32 %v2999_v25, %v1397_v12  ;;  %v1466_v19 = vadd.f32 %v2353_v59, %v1465_v14 }
 0x27a   : > { %v1480_v18 = vmul.f32 %v1478_v11, %v1435_v7 }
 0x27b   : > { %v1470_v25 = vsel %vm1469_vm6, %v2353_v59, %v1466_v19 }
 0x27c   : > { %v1484_v21 = vadd.f32 %v1482_v15, %v1480_v18  ;;  %v1475_v28 = vsel %vm1472_vm7, %v1474_v23, %v1470_v25 }
 0x27e   : > { %2356 = vtanh.f32 %v1484_v21  ;;  %1492 = vst [vmem:[%s2740_s26 + $0x8] sm:$0xff] %v1484_v21 }
 0x27f   : > { %v2355_v24 = vpop.eup %2354 }
 0x280   : > { %v1487_v26 = vmul.f32 %v2355_v24, %v1460_v22 }
 0x282   : > { %1489 = vst [vmem:[%s2734_s19] sm:$0xff] %v1487_v26 }
 0x284   : > { %v2357_v29 = vpop.eup %2356 }
 0x285   : > { %v1488_v30 = vmul.f32 %v2357_v29, %v1475_v28 }
 0x287   : > { %1490 = vst [vmem:[%s2734_s19 + $0x8] sm:$0xff] %v1488_v30  ;;  %v2233_v31 = vpack.c.bf16 %v1488_v30, %v1487_v26 }
 0x289   : > { %2234 = vst [vmem:[#allocation2] sm:$0xff] %v2233_v31  }
 0x28a PF: > { %s25_s12 = sadd.s32 1, %s2523_s12   ;;  %s3146_s10 = sld [smem:[#allocation13_spill]] }
 0x28b   : > { %p22_p12 = scmp.ge.s32.totalorder %s25_s12, 4   ;;  %s3147_s24 = sld [smem:[#allocation11_spill]] }
 0x28c   : > { %s3148_s11 = sld [smem:[#allocation12_spill]]  ;;  %s3149_s27 = smov %s2499_s28 }
 0x28d   : > { %s3150_s28 = smov %s2503_s29  ;;  %s3152_s30 = smov %s2511_s9 }
 0x28e   : > { %s3096_s9 = smov 0   ;;  %24 = sbr.rel (!%p22_p12) target bundleno = 9 (0x9), region = 147 }
 0x290   : > { %s3151_s29 = smov %s3146_s10 }
 0x291   : > { %s3153_s10 = smov %s3147_s24 }
 0x293   :  { %1534 = vsyncpa [#allocation5], 1 }
 0x294   :  { %1536 = vsyncpa [#allocation5 + $0x1], 1 }
 0x295   :  { %1537 = vsyncpa [#allocation7], 1 }
 0x296   :  { %1539 = vsyncpa [#allocation7 + $0x1], 1 }

</bundles_post_ra>
